<compile_context>
chip_gen: v5e
topology: v5e:2x2
jax: 0.10.0
libtpu: 0.0.40
codegen_flags: <defaults>
</compile_context>

<pallas_src>
import jax
import jax.numpy as jnp
from jax import lax
from jax.experimental import pallas as pl
from jax.experimental.pallas import tpu as pltpu

# Full-f32 matmul passes on the MXU for both the kernel and the pure-JAX
# reference, so the correctness check can use tight tolerances.
jax.config.update("jax_default_matmul_precision", "highest")


# ----------------------------------------------------------------------------
# Kernel: whole rollout in one invocation; recurrence is an in-kernel loop.
# ----------------------------------------------------------------------------
def _pcn_seq_kernel(xs_ref, prev0_ref, w1_ref, fb_ref, b1_ref, w2_ref, b2_ref,
                    out_ref, xproj_ref):
    # xs_ref:    (T, B, input_size)     VMEM-resident input sequence
    # prev0_ref: (B, output_size)       initial recurrent state
    # w1_ref:    (input_size, hidden)   layer-1 weight (ones column folded out)
    # fb_ref:    (output_size, hidden)  feedback weights
    # b1_ref:    (1, hidden)            b1 + W1[:, ones-column]
    # w2_ref:    (hidden, output_size)
    # b2_ref:    (1, output_size)
    # out_ref:   (T, B, output_size)    VMEM-resident output slab
    # xproj_ref: (T, B, hidden) f32     scratch: hoisted input projection
    T, B, I = xs_ref.shape
    H = w1_ref.shape[1]

    # ---- Hoisted input projection: one (T*B, I) x (I, H) matmul + bias. ----
    # (T, B, I) -> (T*B, I) is a layout no-op when B is a multiple of 8
    # (second-minor dim is sublane-aligned), as is the reshape back.
    xs_flat = xs_ref[...].reshape(T * B, I).astype(jnp.float32)
    xproj_ref[...] = (
        jnp.dot(xs_flat, w1_ref[...], preferred_element_type=jnp.float32)
        + b1_ref[...]
    ).reshape(T, B, H)

    fb = fb_ref[...].astype(jnp.float32)   # weights stay in vregs across steps
    w2 = w2_ref[...].astype(jnp.float32)
    b2 = b2_ref[...].astype(jnp.float32)

    # ---- Serial recurrence: only prev@fb -> tanh -> @W2 -> softmax per step.
    def step(t, prev):
        hidden = jnp.tanh(
            xproj_ref[t]
            + jnp.dot(prev, fb, preferred_element_type=jnp.float32)
        )
        logits = jnp.dot(hidden, w2, preferred_element_type=jnp.float32) + b2
        # numerically-stable, EXACT softmax
        m = jnp.max(logits, axis=1, keepdims=True)
        e = jnp.exp(logits - m)
        out = e / jnp.sum(e, axis=1, keepdims=True)
        out_ref[t] = out.astype(out_ref.dtype)
        return out                              # recurrent carry

    lax.fori_loop(0, T, step, prev0_ref[...].astype(jnp.float32), unroll=True)


# ----------------------------------------------------------------------------
# pallas_call launcher: everything VMEM-resident, no grid.
# ----------------------------------------------------------------------------
def _pcn_pallas_seq(xs, prev0, params):
    w1p, fb, b1, w2t, b2 = params
    T, B, _ = xs.shape
    H = w1p.shape[1]
    O = w2t.shape[1]

    vmem = pl.BlockSpec(memory_space=pltpu.MemorySpace.VMEM)

    return pl.pallas_call(
        _pcn_seq_kernel,
        out_shape=jax.ShapeDtypeStruct((T, B, O), xs.dtype),
        in_specs=[vmem] * 7,
        out_specs=vmem,
        scratch_shapes=[pltpu.VMEM((T, B, H), jnp.float32)],  # hoisted x-proj
    )(xs, prev0, w1p, fb, b1, w2t, b2)


@jax.jit
def place_cell_forward_seq(xs, params, prev_output=None):
    """Fused recurrent rollout: xs is (T, B, input_size) -> (T, B, output_size)."""
    _, B, _ = xs.shape
    O = params[3].shape[1]
    if prev_output is None:
        prev_output = jnp.zeros((B, O), dtype=xs.dtype)
    return _pcn_pallas_seq(xs, prev_output, params)


@jax.jit
def place_cell_forward(x, params, prev_output=None):
    """Single step, mirrors PlaceCellNetwork.forward. Returns (output, output)."""
    outs = place_cell_forward_seq(x[None], params, prev_output)
    out = outs[0]
    return out, out


# ----------------------------------------------------------------------------
# Parameter init (matches PyTorch module shapes; pre-transposed + bias fold).
# ----------------------------------------------------------------------------
def init_params(key, input_size=2, hidden_size=20, output_size=10, dtype=jnp.float32):
    in_p1 = input_size + 1
    k1, k2, k3, k4, k5 = jax.random.split(key, 5)

    # PyTorch Linear default init: U(-1/sqrt(fan_in), 1/sqrt(fan_in))
    bound1 = 1.0 / (in_p1 ** 0.5)
    w1 = jax.random.uniform(k1, (hidden_size, in_p1), dtype, -bound1, bound1)
    b1 = jax.random.uniform(k2, (hidden_size,), dtype, -bound1, bound1)

    bound2 = 1.0 / (hidden_size ** 0.5)
    w2 = jax.random.uniform(k3, (output_size, hidden_size), dtype, -bound2, bound2)
    b2 = jax.random.uniform(k4, (output_size,), dtype, -bound2, bound2)

    fb = jax.random.normal(k5, (output_size, hidden_size), dtype) * jnp.sqrt(1.0 / output_size)

    w1_t = w1.T                                               # (in_p1, hidden)
    w1_part = w1_t[:input_size]                               # (input_size, hidden)
    b1_eff = (b1 + w1_t[input_size]).reshape(1, hidden_size)  # fold ones column into bias
    return (w1_part, fb, b1_eff, w2.T, b2.reshape(1, output_size))


# ----------------------------------------------------------------------------
# Pure-JAX reference (for correctness checking only).
# ----------------------------------------------------------------------------
def _reference_step(x, prev, params):
    w1p, fb, b1, w2t, b2 = params
    hidden = jnp.tanh(x @ w1p + prev @ fb + b1)
    logits = hidden @ w2t + b2
    return jax.nn.softmax(logits, axis=1)


if __name__ == "__main__":
    key = jax.random.PRNGKey(0)
    kx, kp = jax.random.split(key, 2)

    T, batch, input_size, hidden_size, output_size = 6, 8, 2, 20, 10
    xs = jax.random.normal(kx, (T, batch, input_size), jnp.float32)
    params = init_params(kp, input_size, hidden_size, output_size)

    # fused recurrent rollout: T steps inside one pallas_call
    outs = place_cell_forward_seq(xs, params)                 # (T, B, O)
    jax.block_until_ready(outs)

    # single-step API (same signature/semantics as the torch module)
    out1, out1_dup = place_cell_forward(xs[0], params, prev_output=None)
    out2, _ = place_cell_forward(xs[1], params, prev_output=out1)
    jax.block_until_ready(out2)

    # pure-JAX reference rollout
    prev = jnp.zeros((batch, output_size), jnp.float32)
    refs = []
    for t in range(T):
        prev = _reference_step(xs[t], prev, params)
        refs.append(prev)
    ref = jnp.stack(refs)

    # exact softmax + full-f32 matmuls -> tight tolerances
    assert jnp.allclose(outs, ref, atol=1e-5), float(jnp.max(jnp.abs(outs - ref)))
    assert jnp.allclose(out1, ref[0], atol=1e-5)
    assert jnp.allclose(out2, ref[1], atol=1e-5)
    assert jnp.allclose(out1, out1_dup)
    assert jnp.allclose(jnp.sum(outs, axis=-1), 1.0, atol=1e-5)
    assert outs.shape == (T, batch, output_size)

    print("KERNEL_OK")
</pallas_src>

<mosaic_0001>
module attributes {stable_mosaic.version = 11 : i64} {
  func.func @_pcn_seq_kernel(%arg0: memref<6x8x2xf32, #tpu.memory_space<vmem>>, %arg1: memref<8x10xf32, #tpu.memory_space<vmem>>, %arg2: memref<2x20xf32, #tpu.memory_space<vmem>>, %arg3: memref<10x20xf32, #tpu.memory_space<vmem>>, %arg4: memref<1x20xf32, #tpu.memory_space<vmem>>, %arg5: memref<20x10xf32, #tpu.memory_space<vmem>>, %arg6: memref<1x10xf32, #tpu.memory_space<vmem>>, %arg7: memref<6x8x10xf32, #tpu.memory_space<vmem>>, %arg8: memref<6x8x20xf32, #tpu.memory_space<vmem>>) attributes {dimension_semantics = [], scalar_prefetch = 0 : i64, scratch_operands = 1 : i64, tpu.core_type = #tpu.core_type<tc>} {
    %c0 = arith.constant 0 : index
    %c0_0 = arith.constant 0 : index
    %c0_1 = arith.constant 0 : index
    %0 = vector.load %arg0[%c0, %c0_0, %c0_1] : memref<6x8x2xf32, #tpu.memory_space<vmem>>, vector<6x8x2xf32>
    %1 = vector.shape_cast %0 : vector<6x8x2xf32> to vector<48x2xf32>
    %c0_2 = arith.constant 0 : index
    %c0_3 = arith.constant 0 : index
    %2 = vector.load %arg2[%c0_2, %c0_3] : memref<2x20xf32, #tpu.memory_space<vmem>>, vector<2x20xf32>
    %cst = arith.constant dense<0.000000e+00> : vector<48x20xf32>
    %3 = tpu.matmul %1, %2, %cst {dimension_numbers = #tpu.dot_dimension_numbers<[1], [0], [0], [1], [0, 0, 1, 1], [], []>, precision = #tpu.contract_precision<fp32>} : vector<48x2xf32>, vector<2x20xf32>, vector<48x20xf32> -> vector<48x20xf32>
    %c0_4 = arith.constant 0 : index
    %c0_5 = arith.constant 0 : index
    %4 = vector.load %arg4[%c0_4, %c0_5] : memref<1x20xf32, #tpu.memory_space<vmem>>, vector<1x20xf32>
    %5 = vector.broadcast %4 : vector<1x20xf32> to vector<48x20xf32>
    %6 = arith.addf %3, %5 : vector<48x20xf32>
    %7 = vector.shape_cast %6 : vector<48x20xf32> to vector<6x8x20xf32>
    %c0_6 = arith.constant 0 : index
    %c0_7 = arith.constant 0 : index
    %c0_8 = arith.constant 0 : index
    %8 = vector.load %arg8[%c0_6, %c0_7, %c0_8] : memref<6x8x20xf32, #tpu.memory_space<vmem>>, vector<6x8x20xf32>
    tpu.vector_store %arg8[%c0_6, %c0_7, %c0_8], %7 {strides = array<i32>} : memref<6x8x20xf32, #tpu.memory_space<vmem>>, vector<6x8x20xf32>,
    %c0_9 = arith.constant 0 : index
    %c0_10 = arith.constant 0 : index
    %9 = vector.load %arg3[%c0_9, %c0_10] : memref<10x20xf32, #tpu.memory_space<vmem>>, vector<10x20xf32>
    %c0_11 = arith.constant 0 : index
    %c0_12 = arith.constant 0 : index
    %10 = vector.load %arg5[%c0_11, %c0_12] : memref<20x10xf32, #tpu.memory_space<vmem>>, vector<20x10xf32>
    %c0_13 = arith.constant 0 : index
    %c0_14 = arith.constant 0 : index
    %11 = vector.load %arg6[%c0_13, %c0_14] : memref<1x10xf32, #tpu.memory_space<vmem>>, vector<1x10xf32>
    %c0_15 = arith.constant 0 : index
    %c0_16 = arith.constant 0 : index
    %12 = vector.load %arg1[%c0_15, %c0_16] : memref<8x10xf32, #tpu.memory_space<vmem>>, vector<8x10xf32>
    %c0_i32 = arith.constant 0 : i32
    %13 = arith.index_cast %c0_i32 : i32 to index
    %c0_17 = arith.constant 0 : index
    %c0_18 = arith.constant 0 : index
    %14 = vector.load %arg8[%13, %c0_17, %c0_18] : memref<6x8x20xf32, #tpu.memory_space<vmem>>, vector<1x8x20xf32>
    %15 = vector.shape_cast %14 : vector<1x8x20xf32> to vector<8x20xf32>
    %cst_19 = arith.constant dense<0.000000e+00> : vector<8x20xf32>
    %16 = tpu.matmul %12, %9, %cst_19 {dimension_numbers = #tpu.dot_dimension_numbers<[1], [0], [0], [1], [0, 0, 1, 1], [], []>, precision = #tpu.contract_precision<fp32>} : vector<8x10xf32>, vector<10x20xf32>, vector<8x20xf32> -> vector<8x20xf32>
    %17 = arith.addf %15, %16 : vector<8x20xf32>
    %18 = math.tanh %17 : vector<8x20xf32>
    %cst_20 = arith.constant dense<0.000000e+00> : vector<8x10xf32>
    %19 = tpu.matmul %18, %10, %cst_20 {dimension_numbers = #tpu.dot_dimension_numbers<[1], [0], [0], [1], [0, 0, 1, 1], [], []>, precision = #tpu.contract_precision<fp32>} : vector<8x20xf32>, vector<20x10xf32>, vector<8x10xf32> -> vector<8x10xf32>
    %20 = vector.broadcast %11 : vector<1x10xf32> to vector<8x10xf32>
    %21 = arith.addf %19, %20 : vector<8x10xf32>
    %cst_21 = arith.constant dense<0xFF800000> : vector<8xf32>
    %22 = vector.multi_reduction <maximumf>, %21, %cst_21 [1] : vector<8x10xf32> to vector<8xf32>
    %23 = vector.shape_cast %22 : vector<8xf32> to vector<8x1xf32>
    %24 = vector.broadcast %23 : vector<8x1xf32> to vector<8x10xf32>
    %25 = arith.subf %21, %24 : vector<8x10xf32>
    %26 = math.exp %25 : vector<8x10xf32>
    %cst_22 = arith.constant dense<0.000000e+00> : vector<8xf32>
    %27 = vector.multi_reduction <add>, %26, %cst_22 [1] : vector<8x10xf32> to vector<8xf32>
    %28 = vector.shape_cast %27 : vector<8xf32> to vector<8x1xf32>
    %29 = vector.broadcast %28 : vector<8x1xf32> to vector<8x10xf32>
    %30 = arith.divf %26, %29 : vector<8x10xf32>
    %31 = arith.index_cast %c0_i32 : i32 to index
    %c0_23 = arith.constant 0 : index
    %c0_24 = arith.constant 0 : index
    %32 = vector.load %arg7[%31, %c0_23, %c0_24] : memref<6x8x10xf32, #tpu.memory_space<vmem>>, vector<1x8x10xf32>
    %33 = vector.shape_cast %32 : vector<1x8x10xf32> to vector<8x10xf32>
    %34 = vector.shape_cast %30 : vector<8x10xf32> to vector<1x8x10xf32>
    tpu.vector_store %arg7[%31, %c0_23, %c0_24], %34 {strides = array<i32>} : memref<6x8x10xf32, #tpu.memory_space<vmem>>, vector<1x8x10xf32>,
    %c1_i32 = arith.constant 1 : i32
    %35 = arith.index_cast %c1_i32 : i32 to index
    %c0_25 = arith.constant 0 : index
    %c0_26 = arith.constant 0 : index
    %36 = vector.load %arg8[%35, %c0_25, %c0_26] : memref<6x8x20xf32, #tpu.memory_space<vmem>>, vector<1x8x20xf32>
    %37 = vector.shape_cast %36 : vector<1x8x20xf32> to vector<8x20xf32>
    %cst_27 = arith.constant dense<0.000000e+00> : vector<8x20xf32>
    %38 = tpu.matmul %30, %9, %cst_27 {dimension_numbers = #tpu.dot_dimension_numbers<[1], [0], [0], [1], [0, 0, 1, 1], [], []>, precision = #tpu.contract_precision<fp32>} : vector<8x10xf32>, vector<10x20xf32>, vector<8x20xf32> -> vector<8x20xf32>
    %39 = arith.addf %37, %38 : vector<8x20xf32>
    %40 = math.tanh %39 : vector<8x20xf32>
    %cst_28 = arith.constant dense<0.000000e+00> : vector<8x10xf32>
    %41 = tpu.matmul %40, %10, %cst_28 {dimension_numbers = #tpu.dot_dimension_numbers<[1], [0], [0], [1], [0, 0, 1, 1], [], []>, precision = #tpu.contract_precision<fp32>} : vector<8x20xf32>, vector<20x10xf32>, vector<8x10xf32> -> vector<8x10xf32>
    %42 = vector.broadcast %11 : vector<1x10xf32> to vector<8x10xf32>
    %43 = arith.addf %41, %42 : vector<8x10xf32>
    %cst_29 = arith.constant dense<0xFF800000> : vector<8xf32>
    %44 = vector.multi_reduction <maximumf>, %43, %cst_29 [1] : vector<8x10xf32> to vector<8xf32>
    %45 = vector.shape_cast %44 : vector<8xf32> to vector<8x1xf32>
    %46 = vector.broadcast %45 : vector<8x1xf32> to vector<8x10xf32>
    %47 = arith.subf %43, %46 : vector<8x10xf32>
    %48 = math.exp %47 : vector<8x10xf32>
    %cst_30 = arith.constant dense<0.000000e+00> : vector<8xf32>
    %49 = vector.multi_reduction <add>, %48, %cst_30 [1] : vector<8x10xf32> to vector<8xf32>
    %50 = vector.shape_cast %49 : vector<8xf32> to vector<8x1xf32>
    %51 = vector.broadcast %50 : vector<8x1xf32> to vector<8x10xf32>
    %52 = arith.divf %48, %51 : vector<8x10xf32>
    %53 = arith.index_cast %c1_i32 : i32 to index
    %c0_31 = arith.constant 0 : index
    %c0_32 = arith.constant 0 : index
    %54 = vector.load %arg7[%53, %c0_31, %c0_32] : memref<6x8x10xf32, #tpu.memory_space<vmem>>, vector<1x8x10xf32>
    %55 = vector.shape_cast %54 : vector<1x8x10xf32> to vector<8x10xf32>
    %56 = vector.shape_cast %52 : vector<8x10xf32> to vector<1x8x10xf32>
    tpu.vector_store %arg7[%53, %c0_31, %c0_32], %56 {strides = array<i32>} : memref<6x8x10xf32, #tpu.memory_space<vmem>>, vector<1x8x10xf32>,
    %c2_i32 = arith.constant 2 : i32
    %57 = arith.index_cast %c2_i32 : i32 to index
    %c0_33 = arith.constant 0 : index
    %c0_34 = arith.constant 0 : index
    %58 = vector.load %arg8[%57, %c0_33, %c0_34] : memref<6x8x20xf32, #tpu.memory_space<vmem>>, vector<1x8x20xf32>
    %59 = vector.shape_cast %58 : vector<1x8x20xf32> to vector<8x20xf32>
    %cst_35 = arith.constant dense<0.000000e+00> : vector<8x20xf32>
    %60 = tpu.matmul %52, %9, %cst_35 {dimension_numbers = #tpu.dot_dimension_numbers<[1], [0], [0], [1], [0, 0, 1, 1], [], []>, precision = #tpu.contract_precision<fp32>} : vector<8x10xf32>, vector<10x20xf32>, vector<8x20xf32> -> vector<8x20xf32>
    %61 = arith.addf %59, %60 : vector<8x20xf32>
    %62 = math.tanh %61 : vector<8x20xf32>
    %cst_36 = arith.constant dense<0.000000e+00> : vector<8x10xf32>
    %63 = tpu.matmul %62, %10, %cst_36 {dimension_numbers = #tpu.dot_dimension_numbers<[1], [0], [0], [1], [0, 0, 1, 1], [], []>, precision = #tpu.contract_precision<fp32>} : vector<8x20xf32>, vector<20x10xf32>, vector<8x10xf32> -> vector<8x10xf32>
    %64 = vector.broadcast %11 : vector<1x10xf32> to vector<8x10xf32>
    %65 = arith.addf %63, %64 : vector<8x10xf32>
    %cst_37 = arith.constant dense<0xFF800000> : vector<8xf32>
    %66 = vector.multi_reduction <maximumf>, %65, %cst_37 [1] : vector<8x10xf32> to vector<8xf32>
    %67 = vector.shape_cast %66 : vector<8xf32> to vector<8x1xf32>
    %68 = vector.broadcast %67 : vector<8x1xf32> to vector<8x10xf32>
    %69 = arith.subf %65, %68 : vector<8x10xf32>
    %70 = math.exp %69 : vector<8x10xf32>
    %cst_38 = arith.constant dense<0.000000e+00> : vector<8xf32>
    %71 = vector.multi_reduction <add>, %70, %cst_38 [1] : vector<8x10xf32> to vector<8xf32>
    %72 = vector.shape_cast %71 : vector<8xf32> to vector<8x1xf32>
    %73 = vector.broadcast %72 : vector<8x1xf32> to vector<8x10xf32>
    %74 = arith.divf %70, %73 : vector<8x10xf32>
    %75 = arith.index_cast %c2_i32 : i32 to index
    %c0_39 = arith.constant 0 : index
    %c0_40 = arith.constant 0 : index
    %76 = vector.load %arg7[%75, %c0_39, %c0_40] : memref<6x8x10xf32, #tpu.memory_space<vmem>>, vector<1x8x10xf32>
    %77 = vector.shape_cast %76 : vector<1x8x10xf32> to vector<8x10xf32>
    %78 = vector.shape_cast %74 : vector<8x10xf32> to vector<1x8x10xf32>
    tpu.vector_store %arg7[%75, %c0_39, %c0_40], %78 {strides = array<i32>} : memref<6x8x10xf32, #tpu.memory_space<vmem>>, vector<1x8x10xf32>,
    %c3_i32 = arith.constant 3 : i32
    %79 = arith.index_cast %c3_i32 : i32 to index
    %c0_41 = arith.constant 0 : index
    %c0_42 = arith.constant 0 : index
    %80 = vector.load %arg8[%79, %c0_41, %c0_42] : memref<6x8x20xf32, #tpu.memory_space<vmem>>, vector<1x8x20xf32>
    %81 = vector.shape_cast %80 : vector<1x8x20xf32> to vector<8x20xf32>
    %cst_43 = arith.constant dense<0.000000e+00> : vector<8x20xf32>
    %82 = tpu.matmul %74, %9, %cst_43 {dimension_numbers = #tpu.dot_dimension_numbers<[1], [0], [0], [1], [0, 0, 1, 1], [], []>, precision = #tpu.contract_precision<fp32>} : vector<8x10xf32>, vector<10x20xf32>, vector<8x20xf32> -> vector<8x20xf32>
    %83 = arith.addf %81, %82 : vector<8x20xf32>
    %84 = math.tanh %83 : vector<8x20xf32>
    %cst_44 = arith.constant dense<0.000000e+00> : vector<8x10xf32>
    %85 = tpu.matmul %84, %10, %cst_44 {dimension_numbers = #tpu.dot_dimension_numbers<[1], [0], [0], [1], [0, 0, 1, 1], [], []>, precision = #tpu.contract_precision<fp32>} : vector<8x20xf32>, vector<20x10xf32>, vector<8x10xf32> -> vector<8x10xf32>
    %86 = vector.broadcast %11 : vector<1x10xf32> to vector<8x10xf32>
    %87 = arith.addf %85, %86 : vector<8x10xf32>
    %cst_45 = arith.constant dense<0xFF800000> : vector<8xf32>
    %88 = vector.multi_reduction <maximumf>, %87, %cst_45 [1] : vector<8x10xf32> to vector<8xf32>
    %89 = vector.shape_cast %88 : vector<8xf32> to vector<8x1xf32>
    %90 = vector.broadcast %89 : vector<8x1xf32> to vector<8x10xf32>
    %91 = arith.subf %87, %90 : vector<8x10xf32>
    %92 = math.exp %91 : vector<8x10xf32>
    %cst_46 = arith.constant dense<0.000000e+00> : vector<8xf32>
    %93 = vector.multi_reduction <add>, %92, %cst_46 [1] : vector<8x10xf32> to vector<8xf32>
    %94 = vector.shape_cast %93 : vector<8xf32> to vector<8x1xf32>
    %95 = vector.broadcast %94 : vector<8x1xf32> to vector<8x10xf32>
    %96 = arith.divf %92, %95 : vector<8x10xf32>
    %97 = arith.index_cast %c3_i32 : i32 to index
    %c0_47 = arith.constant 0 : index
    %c0_48 = arith.constant 0 : index
    %98 = vector.load %arg7[%97, %c0_47, %c0_48] : memref<6x8x10xf32, #tpu.memory_space<vmem>>, vector<1x8x10xf32>
    %99 = vector.shape_cast %98 : vector<1x8x10xf32> to vector<8x10xf32>
    %100 = vector.shape_cast %96 : vector<8x10xf32> to vector<1x8x10xf32>
    tpu.vector_store %arg7[%97, %c0_47, %c0_48], %100 {strides = array<i32>} : memref<6x8x10xf32, #tpu.memory_space<vmem>>, vector<1x8x10xf32>,
    %c4_i32 = arith.constant 4 : i32
    %101 = arith.index_cast %c4_i32 : i32 to index
    %c0_49 = arith.constant 0 : index
    %c0_50 = arith.constant 0 : index
    %102 = vector.load %arg8[%101, %c0_49, %c0_50] : memref<6x8x20xf32, #tpu.memory_space<vmem>>, vector<1x8x20xf32>
    %103 = vector.shape_cast %102 : vector<1x8x20xf32> to vector<8x20xf32>
    %cst_51 = arith.constant dense<0.000000e+00> : vector<8x20xf32>
    %104 = tpu.matmul %96, %9, %cst_51 {dimension_numbers = #tpu.dot_dimension_numbers<[1], [0], [0], [1], [0, 0, 1, 1], [], []>, precision = #tpu.contract_precision<fp32>} : vector<8x10xf32>, vector<10x20xf32>, vector<8x20xf32> -> vector<8x20xf32>
    %105 = arith.addf %103, %104 : vector<8x20xf32>
    %106 = math.tanh %105 : vector<8x20xf32>
    %cst_52 = arith.constant dense<0.000000e+00> : vector<8x10xf32>
    %107 = tpu.matmul %106, %10, %cst_52 {dimension_numbers = #tpu.dot_dimension_numbers<[1], [0], [0], [1], [0, 0, 1, 1], [], []>, precision = #tpu.contract_precision<fp32>} : vector<8x20xf32>, vector<20x10xf32>, vector<8x10xf32> -> vector<8x10xf32>
    %108 = vector.broadcast %11 : vector<1x10xf32> to vector<8x10xf32>
    %109 = arith.addf %107, %108 : vector<8x10xf32>
    %cst_53 = arith.constant dense<0xFF800000> : vector<8xf32>
    %110 = vector.multi_reduction <maximumf>, %109, %cst_53 [1] : vector<8x10xf32> to vector<8xf32>
    %111 = vector.shape_cast %110 : vector<8xf32> to vector<8x1xf32>
    %112 = vector.broadcast %111 : vector<8x1xf32> to vector<8x10xf32>
    %113 = arith.subf %109, %112 : vector<8x10xf32>
    %114 = math.exp %113 : vector<8x10xf32>
    %cst_54 = arith.constant dense<0.000000e+00> : vector<8xf32>
    %115 = vector.multi_reduction <add>, %114, %cst_54 [1] : vector<8x10xf32> to vector<8xf32>
    %116 = vector.shape_cast %115 : vector<8xf32> to vector<8x1xf32>
    %117 = vector.broadcast %116 : vector<8x1xf32> to vector<8x10xf32>
    %118 = arith.divf %114, %117 : vector<8x10xf32>
    %119 = arith.index_cast %c4_i32 : i32 to index
    %c0_55 = arith.constant 0 : index
    %c0_56 = arith.constant 0 : index
    %120 = vector.load %arg7[%119, %c0_55, %c0_56] : memref<6x8x10xf32, #tpu.memory_space<vmem>>, vector<1x8x10xf32>
    %121 = vector.shape_cast %120 : vector<1x8x10xf32> to vector<8x10xf32>
    %122 = vector.shape_cast %118 : vector<8x10xf32> to vector<1x8x10xf32>
    tpu.vector_store %arg7[%119, %c0_55, %c0_56], %122 {strides = array<i32>} : memref<6x8x10xf32, #tpu.memory_space<vmem>>, vector<1x8x10xf32>,
    %c5_i32 = arith.constant 5 : i32
    %123 = arith.index_cast %c5_i32 : i32 to index
    %c0_57 = arith.constant 0 : index
    %c0_58 = arith.constant 0 : index
    %124 = vector.load %arg8[%123, %c0_57, %c0_58] : memref<6x8x20xf32, #tpu.memory_space<vmem>>, vector<1x8x20xf32>
    %125 = vector.shape_cast %124 : vector<1x8x20xf32> to vector<8x20xf32>
    %cst_59 = arith.constant dense<0.000000e+00> : vector<8x20xf32>
    %126 = tpu.matmul %118, %9, %cst_59 {dimension_numbers = #tpu.dot_dimension_numbers<[1], [0], [0], [1], [0, 0, 1, 1], [], []>, precision = #tpu.contract_precision<fp32>} : vector<8x10xf32>, vector<10x20xf32>, vector<8x20xf32> -> vector<8x20xf32>
    %127 = arith.addf %125, %126 : vector<8x20xf32>
    %128 = math.tanh %127 : vector<8x20xf32>
    %cst_60 = arith.constant dense<0.000000e+00> : vector<8x10xf32>
    %129 = tpu.matmul %128, %10, %cst_60 {dimension_numbers = #tpu.dot_dimension_numbers<[1], [0], [0], [1], [0, 0, 1, 1], [], []>, precision = #tpu.contract_precision<fp32>} : vector<8x20xf32>, vector<20x10xf32>, vector<8x10xf32> -> vector<8x10xf32>
    %130 = vector.broadcast %11 : vector<1x10xf32> to vector<8x10xf32>
    %131 = arith.addf %129, %130 : vector<8x10xf32>
    %cst_61 = arith.constant dense<0xFF800000> : vector<8xf32>
    %132 = vector.multi_reduction <maximumf>, %131, %cst_61 [1] : vector<8x10xf32> to vector<8xf32>
    %133 = vector.shape_cast %132 : vector<8xf32> to vector<8x1xf32>
    %134 = vector.broadcast %133 : vector<8x1xf32> to vector<8x10xf32>
    %135 = arith.subf %131, %134 : vector<8x10xf32>
    %136 = math.exp %135 : vector<8x10xf32>
    %cst_62 = arith.constant dense<0.000000e+00> : vector<8xf32>
    %137 = vector.multi_reduction <add>, %136, %cst_62 [1] : vector<8x10xf32> to vector<8xf32>
    %138 = vector.shape_cast %137 : vector<8xf32> to vector<8x1xf32>
    %139 = vector.broadcast %138 : vector<8x1xf32> to vector<8x10xf32>
    %140 = arith.divf %136, %139 : vector<8x10xf32>
    %141 = arith.index_cast %c5_i32 : i32 to index
    %c0_63 = arith.constant 0 : index
    %c0_64 = arith.constant 0 : index
    %142 = vector.load %arg7[%141, %c0_63, %c0_64] : memref<6x8x10xf32, #tpu.memory_space<vmem>>, vector<1x8x10xf32>
    %143 = vector.shape_cast %142 : vector<1x8x10xf32> to vector<8x10xf32>
    %144 = vector.shape_cast %140 : vector<8x10xf32> to vector<1x8x10xf32>
    tpu.vector_store %arg7[%141, %c0_63, %c0_64], %144 {strides = array<i32>} : memref<6x8x10xf32, #tpu.memory_space<vmem>>, vector<1x8x10xf32>,
    %c6_i32 = arith.constant 6 : i32
    return
  }
}

</mosaic_0001>

<bundles_post_ra>
// kernel: place_cell_forward_seq.1
= control target key start
LH: loop header
LB: loop body
LE: loop exit
PB: predicated region body
PF: predicated region fallthrough
CT: control target
= control target key end

     0   :  { %vm57_vm0 = vcmask 1041408   ;;  %vm38_vm1 = vcmask 15360   ;;  %s3136_s0 = inlined_call_operand.vmem [shape: f32[6,8,2], index: 0, kind: input, shape index: {}]   ;;  %s3137_s1 = inlined_call_operand.vmem [shape: f32[8,10], index: 1, kind: input, shape index: {}]   ;;  %s3138_s2 = inlined_call_operand.vmem [shape: f32[2,20], index: 2, kind: input, shape index: {}]   ;;  %s3139_s3 = inlined_call_operand.vmem [shape: f32[10,20], index: 3, kind: input, shape index: {}]   ;;  %s3140_s4 = inlined_call_operand.vmem [shape: f32[1,20], index: 4, kind: input, shape index: {}]   ;;  %s3141_s5 = inlined_call_operand.vmem [shape: f32[20,10], index: 5, kind: input, shape index: {}]   ;;  %s3142_s6 = inlined_call_operand.vmem [shape: f32[1,10], index: 6, kind: input, shape index: {}]   ;;  %s3143_s7 = inlined_call_operand.hbm [shape: f32[6,8,10], index: 7, kind: output, shape index: {}]  }
   0x1   :  { %v33_v0 = vld [vmem:[%s3138_s2] sm:$0x3]  ;;  %v370_v1 = vld [vmem:[%s3139_s3 + $0x8] sm:$0x3]  ;;  %v29_v13 = vld [vmem:[%s3136_s0 + $0x10] sm:$0xff] }
   0x2   :  { %v27_v2 = vld [vmem:[%s3136_s0] sm:$0xff]  ;;  %v59_v3 = vsel %vm57_vm0, %v33_v0, 0  ;;  %v382_v4 = vsel %vm57_vm0, %v370_v1, 0  ;;  %v28_v5 = vld [vmem:[%s3136_s0 + $0x8] sm:$0xff] }
   0x3   :  { %v76_v6 = vand.u32 4294901760, %v59_v3  ;;  %v2728_v7 = vand.u32 4294901760, %v382_v4  ;;  %v40_v8 = vsel %vm38_vm1, %v27_v2, 0  ;;  %v43_v9 = vsel %vm38_vm1, %v28_v5, 0  ;;  %v369_v10 = vld [vmem:[%s3139_s3] sm:$0xff] }
   0x4   :  { %v2735_v11 = vand.u32 4294901760, %v40_v8  ;;  %v2737_v12 = vand.u32 4294901760, %v43_v9 }
   0x5   :  { %v143_v14 = vsub.f32 %v59_v3, %v76_v6  ;;  %v2743_v15 = vsub.f32 %v382_v4, %v2728_v7  ;;  %238 = vmatpush.msra.mxu3 %v76_v6  ;;  %77 = vmatpush.msra.mxu0 %v76_v6 }
   0x6   :  { %12 = vsyncpa [#allocation4], 0  ;;  %v79_v16 = vsub.f32 %v40_v8, %v2735_v11  ;;  %v87_v17 = vsub.f32 %v43_v9, %v2737_v12  ;;  %v2747_v18 = vand.u32 4294901760, %v369_v10  ;;  %v46_v21 = vsel %vm38_vm1, %v29_v13, 0  ;;  %v30_v33 = vld [vmem:[%s3136_s0 + $0x18] sm:$0xff]  ;;  %v31_v42 = vld [vmem:[%s3136_s0 + $0x20] sm:$0xff] }
   0x7   :  { %190 = vmatpush.msra.mxu2 %v143_v14  ;;  %v2750_v19 = vand.u32 4294901760, %v2743_v15  ;;  %v144_v20 = vand.u32 4294901760, %v143_v14  ;;  %v2759_v28 = vand.u32 4294901760, %v46_v21  ;;  %v49_v38 = vsel %vm38_vm1, %v30_v33, 0  ;;  %v32_v49 = vld [vmem:[%s3136_s0 + $0x28] sm:$0xff]  ;;  %v375_v52 = vld [vmem:[%s3137_s1] sm:$0xff] }
   0x8   :  { %193 = vmatmul.f32.vlgmr.msra.gmra.mxu2 %v79_v16  ;;  %v80_v22 = vand.u32 4294901760, %v79_v16  ;;  %v2754_v23 = vsub.f32 %v369_v10, %v2747_v18  ;;  %v88_v27 = vand.u32 4294901760, %v87_v17  ;;  %v2783_v41 = vand.u32 4294901760, %v49_v38  ;;  %s2593_s30 = sshll.u32 %s3143_s7, 4  ;;  %s2674_s8 = smov 128   ;;  %s2594_s30 = int_to_ptr.hbm [resolvable:$true] %s2593_s30 }
   0x9   :  { %399 = vmatpush.msrb.mxu2 %v2728_v7  ;;  %v428_v24 = vsub.f32 %v2743_v15, %v2750_v19  ;;  %v145_v25 = vsub.f32 %v143_v14, %v144_v20  ;;  %294 = vmatpush.msrb.mxu0 %v144_v20  ;;  %v95_v36 = vsub.f32 %v46_v21, %v2759_v28  ;;  %v52_v45 = vsel %vm38_vm1, %v31_v42, 0  ;;  %v371_v42 = vld [vmem:[%s3141_s5] sm:$0xff]  ;;  %s2675_s2 = smov 8  }
   0xa   :  { %242 = vmatmul.f32.vlgmr.msra.gmra.mxu3 %v80_v22  ;;  %v81_v26 = vsub.f32 %v79_v16, %v80_v22  ;;  %v2762_v29 = vand.u32 4294901760, %v2754_v23  ;;  %v89_v35 = vsub.f32 %v87_v17, %v88_v27  ;;  %v103_v44 = vsub.f32 %v49_v38, %v2783_v41  ;;  %v372_v38 = vld [vmem:[%s3141_s5 + $0x8] sm:$0xff] }
   0xb   :  { %v2764_v30 = vand.u32 4294901760, %v428_v24  ;;  %v146_v31 = vand.u32 4294901760, %v145_v25  ;;  %401 = vmatpush.msrb.mxu2 %v2747_v18  ;;  %v96_v40 = vand.u32 4294901760, %v95_v36  ;;  %v110_v48 = vand.u32 4294901760, %v52_v45 }
   0xc   :  { %v82_v32 = vand.u32 4294901760, %v81_v26  ;;  %v434_v34 = vsub.f32 %v2754_v23, %v2762_v29  ;;  %v90_v39 = vand.u32 4294901760, %v89_v35  ;;  %v104_v47 = vand.u32 4294901760, %v103_v44  ;;  %v2840_v26 = vld [vmem:[%s3140_s4] ss:$0 sm:$0xff] }
   0xd   :  { %458 = vmatpush.msra.mxu2 %v2743_v15  ;;  %430 = vmatpush.msrb.mxu3 %v2764_v30  ;;  %v97_v43 = vsub.f32 %v95_v36, %v96_v40  ;;  %v111_v51 = vsub.f32 %v52_v45, %v110_v48  ;;  %vm377_vm2 = vcmask 80896   ;;  %v55_v53 = vsel %vm38_vm1, %v32_v49, 0 }
   0xe   :  { %147 = vmatpush.msra.mxu1 %v146_v31  ;;  %83 = vmatmul.f32.vlgmr.msra.gmra.mxu0 %v82_v32  ;;  %v2776_v37 = vand.u32 4294901760, %v434_v34  ;;  %v105_v50 = vsub.f32 %v103_v44, %v104_v47  ;;  %v379_v54 = vsel %vm377_vm2, %v375_v52, 0  ;;  %v118_v57 = vand.u32 4294901760, %v55_v53  ;;  %v373_v32 = vld [vmem:[%s3141_s5 + $0x10] sm:$0xf] }
   0xf   :  { %149 = vmatmul.f32.vlgmr.msra.gmra.mxu1 %v2735_v11  ;;  %461 = vmatpush.msra.mxu2 %v2754_v23  ;;  %v98_v46 = vand.u32 4294901760, %v97_v43  ;;  %v112_v56 = vand.u32 4294901760, %v111_v51  ;;  %v402_v58 = vand.u32 4294901760, %v379_v54  ;;  %vm551_vm3 = vcmask 1043456  }
  0x10   :  { %336 = vmatpush.msrb.mxu1 %v76_v6  ;;  %198 = vmatmul.f32.gmra.mxu2 %v87_v17  ;;  %v106_v55 = vand.u32 4294901760, %v105_v50  ;;  %v119_v60 = vsub.f32 %v55_v53, %v118_v57  ;;  %v553_v35 = vsel %vm551_vm3, %v373_v32, 0  ;;  %v2874_v45 = vand.u32 4294901760, %v371_v42 }
  0x11   :  { %436 = vmatpush.msrb.mxu3 %v2776_v37  ;;  %772 = vmatpush.msra.mxu0 %v2728_v7  ;;  %v113_v59 = vsub.f32 %v111_v51, %v112_v56  ;;  %v403_v61 = vsub.f32 %v379_v54, %v402_v58  ;;  %vm362_vm4 = vcmask 162816  }
  0x12   :  { %248 = vmatmul.f32.gmra.mxu3 %v88_v27  ;;  %803 = vmatpush.msra.mxu1 %v2764_v30  ;;  %v120_v63 = vand.u32 4294901760, %v119_v60 }
  0x13   :  { %483 = vmatpush.msra.mxu3 %v2728_v7  ;;  %774 = vmatpush.msra.mxu0 %v2747_v18  ;;  %v114_v62 = vand.u32 4294901760, %v113_v59  ;;  %v404_v0 = vand.u32 4294901760, %v403_v61 }
  0x14   :  { %809 = vmatpush.msra.mxu1 %v2776_v37  ;;  %v121_v1 = vsub.f32 %v119_v60, %v120_v63 }
  0x15   :  { %485 = vmatpush.msra.mxu3 %v2747_v18  ;;  %v405_v2 = vsub.f32 %v403_v61, %v404_v0 }
  0x16   :  { %91 = vmatmul.f32.gmra.mxu0 %v90_v39  ;;  %v122_v3 = vand.u32 4294901760, %v121_v1 }
  0x17   :  { %153 = vmatmul.f32.gmra.mxu1 %v2737_v12  ;;  %v406_v4 = vand.u32 4294901760, %v405_v2 }
  0x18   :  { %203 = vmatmul.f32.gmra.mxu2 %v95_v36  ;;  %v2854_v36 = vand.u32 4294901760, %v553_v35 }
  0x1a   :  { %254 = vmatmul.f32.gmra.mxu3 %v96_v40  ;;  %v2860_v39 = vsub.f32 %v553_v35, %v2854_v36  ;;  %v2862_v40 = vand.u32 4294901760, %v372_v38 }
  0x1c   :  { %v2869_v43 = vand.u32 4294901760, %v2860_v39 }
  0x1e   :  { %99 = vmatmul.f32.gmra.mxu0 %v98_v46  ;;  %v599_v49 = vsub.f32 %v2860_v39, %v2869_v43 }
  0x1f   :  { %157 = vmatmul.f32.gmra.mxu1 %v2759_v28 }
  0x20   :  { %208 = vmatmul.f32.gmra.mxu2 %v103_v44  ;;  %v2872_v44 = vsub.f32 %v372_v38, %v2862_v40 }
  0x22   :  { %260 = vmatmul.f32.gmra.mxu3 %v104_v47  ;;  %v2886_v50 = vand.u32 4294901760, %v2872_v44 }
  0x26   :  { %107 = vmatmul.f32.gmra.mxu0 %v106_v55  ;;  %v2896_v55 = vand.u32 4294901760, %v599_v49 }
  0x27   :  { %161 = vmatmul.f32.gmra.mxu1 %v2783_v41 }
  0x28   :  { %213 = vmatmul.f32.gmra.mxu2 %v111_v51  ;;  %v2889_v51 = vsub.f32 %v371_v42, %v2874_v45 }
  0x2a   :  { %266 = vmatmul.f32.gmra.mxu3 %v112_v56  ;;  %v605_v56 = vsub.f32 %v2872_v44, %v2886_v50 }
  0x2e   :  { %115 = vmatmul.f32.gmra.mxu0 %v114_v62 }
  0x2f   :  { %165 = vmatmul.f32.gmra.mxu1 %v110_v48 }
  0x30   :  { %218 = vmatmul.f32.gmra.mxu2 %v119_v60 }
  0x32   :  { %272 = vmatmul.f32.gmra.mxu3 %v120_v63 }
  0x36   :  { %123 = vmatmul.f32.gmra.mxu0 %v122_v3 }
  0x37   :  { %169 = vmatmul.f32.gmra.mxu1 %v118_v57 }
  0x38   :  { %407 = vmatmul.f32.vlgmr.msrb.gmra.mxu2 %v406_v4 }
  0x39   :  { %510 = vmatpush.msrb.mxu2 %v2750_v19 }
  0x3a   :  { %438 = vmatmul.f32.vlgmr.msrb.gmra.mxu3 %v402_v58 }
  0x3b   :  { %535 = vmatpush.msrb.mxu3 %v2728_v7  ;;  %514 = vmatpush.msrb.mxu2 %v2762_v29 }
  0x3d   :  { %537 = vmatpush.msrb.mxu3 %v2747_v18 }
  0x3e   :  { %296 = vmatmul.f32.vlgmr.msrb.gmra.mxu0 %v2735_v11 }
  0x3f   :  { %338 = vmatmul.f32.vlgmr.msrb.gmra.mxu1 %v2735_v11  ;;  %883 = vmatpush.msrb.mxu0 %v2750_v19 }
  0x40   :  { %908 = vmatpush.msrb.mxu1 %v2728_v7  ;;  %464 = vmatmul.f32.vlgmr.msra.gmra.mxu2 %v403_v61 }
  0x41   :  { %887 = vmatpush.msrb.mxu0 %v2762_v29  ;;  %569 = vmatpush.msra.mxu2 %v2854_v36 }
  0x42   :  { %910 = vmatpush.msrb.mxu1 %v2747_v18  ;;  %489 = vmatmul.f32.vlgmr.msra.gmra.mxu3 %v404_v0 }
  0x43   :  { %571 = vmatpush.msra.mxu2 %v2862_v40  ;;  %601 = vmatpush.msra.mxu3 %v2896_v55 }
  0x45   :  { %573 = vmatpush.msra.mxu2 %v2874_v45 }
  0x46   :  { %300 = vmatmul.f32.gmra.mxu0 %v2737_v12 }
  0x47   :  { %342 = vmatmul.f32.gmra.mxu1 %v2737_v12 }
  0x48   :  { %516 = vmatmul.f32.vlgmr.msrb.gmra.mxu2 %v402_v58 }
  0x49   :  { %634 = vmatpush.msrb.mxu2 %v2860_v39 }
  0x4a   :  { %539 = vmatmul.f32.vlgmr.msrb.gmra.mxu3 %v402_v58  ;;  %v2905_v58 = vand.u32 4294901760, %v605_v56 }
  0x4b   :  { %637 = vmatpush.msrb.mxu2 %v2872_v44 }
  0x4c   :  { %607 = vmatpush.msra.mxu3 %v2905_v58 }
  0x4d   :  { %640 = vmatpush.msrb.mxu2 %v2889_v51 }
  0x4e   :  { %304 = vmatmul.f32.gmra.mxu0 %v2759_v28 }
  0x4f   :  { %346 = vmatmul.f32.gmra.mxu1 %v2759_v28 }
  0x56   :  { %308 = vmatmul.f32.gmra.mxu0 %v2783_v41 }
  0x57   :  { %350 = vmatmul.f32.gmra.mxu1 %v2783_v41 }
  0x5e   :  { %312 = vmatmul.f32.gmra.mxu0 %v110_v48 }
  0x5f   :  { %354 = vmatmul.f32.gmra.mxu1 %v110_v48 }
  0x66   :  { %316 = vmatmul.f32.gmra.mxu0 %v118_v57 }
  0x67   :  { %358 = vmatmul.f32.gmra.mxu1 %v118_v57  ;;  %v2901_v57 = vand.u32 4294901760, %v2889_v51 }
  0x69   :  { %v611_v59 = vsub.f32 %v2889_v51, %v2901_v57 }
  0x6b   :  { %v2911_v62 = vand.u32 4294901760, %v611_v59 }
  0x6d   :  { %613 = vmatpush.msra.mxu3 %v2911_v62 }
  0x6f   :  { %661 = vmatpush.msrb.mxu3 %v2854_v36 }
  0x71   :  { %663 = vmatpush.msrb.mxu3 %v2862_v40 }
  0x73   :  { %665 = vmatpush.msrb.mxu3 %v2874_v45 }
  0x8b   :  { %v84_v5 = vpop.f32.mrf.mxu0  ;;  %v194_v6 = vpop.f32.mrf.mxu2 }
  0x8c   :  { %v150_v8 = vpop.f32.mrf.mxu1  ;;  %v85_v33 = vadd.f32 %v2840_v26, %v84_v5 }
  0x8d   :  { %v243_v9 = vpop.f32.mrf.mxu3 }
  0x8e   :  { %v151_v41 = vadd.f32 %v150_v8, %v85_v33 }
  0x90   :  { %v195_v52 = vadd.f32 %v194_v6, %v151_v41 }
  0x92   :  { %v244_v60 = vadd.f32 %v243_v9, %v195_v52 }
  0x93   :  { %v92_v10 = vpop.f32.mrf.mxu0  ;;  %v199_v11 = vpop.f32.mrf.mxu2 }
  0x94   :  { %v154_v12 = vpop.f32.mrf.mxu1  ;;  %v93_v54 = vadd.f32 %v2840_v26, %v92_v10 }
  0x95   :  { %v2821_v13 = vpop.f32.mrf.mxu3 }
  0x96   :  { %v155_v61 = vadd.f32 %v154_v12, %v93_v54 }
  0x98   :  { %v200_v4 = vadd.f32 %v199_v11, %v155_v61 }
  0x9a   :  { %v250_v8 = vadd.f32 %v2821_v13, %v200_v4 }
  0x9b   :  { %v100_v14 = vpop.f32.mrf.mxu0  ;;  %v2823_v16 = vpop.f32.mrf.mxu2 }
  0x9c   :  { %v2825_v17 = vpop.f32.mrf.mxu1  ;;  %v101_v5 = vadd.f32 %v2840_v26, %v100_v14 }
  0x9d   :  { %v2827_v20 = vpop.f32.mrf.mxu3 }
  0x9e   :  { %v159_v9 = vadd.f32 %v2825_v17, %v101_v5 }
  0xa0   :  { %v205_v11 = vadd.f32 %v2823_v16, %v159_v9 }
  0xa2   :  { %v256_v49 = vadd.f32 %v2827_v20, %v205_v11 }
  0xa3   :  { %v2829_v21 = vpop.f32.mrf.mxu0  ;;  %v2831_v22 = vpop.f32.mrf.mxu2 }
  0xa4   :  { %v2833_v24 = vpop.f32.mrf.mxu1  ;;  %v109_v14 = vadd.f32 %v2840_v26, %v2829_v21 }
  0xa5   :  { %v2835_v25 = vpop.f32.mrf.mxu3 }
  0xa6   :  { %v163_v13 = vadd.f32 %v2833_v24, %v109_v14 }
  0xa8   :  { %v210_v16 = vadd.f32 %v2831_v22, %v163_v13 }
  0xaa   :  { %v262_v24 = vadd.f32 %v2835_v25, %v210_v16 }
  0xab   :  { %v2842_v27 = vpop.f32.mrf.mxu0  ;;  %v2844_v28 = vpop.f32.mrf.mxu2 }
  0xac   :  { %v2846_v31 = vpop.f32.mrf.mxu1  ;;  %v117_v21 = vadd.f32 %v2840_v26, %v2842_v27 }
  0xad   :  { %v2852_v34 = vpop.f32.mrf.mxu3 }
  0xb3   :  { %v2877_v46 = vpop.f32.mrf.mxu0  ;;  %v2879_v47 = vpop.f32.mrf.mxu2 }
  0xb4   :  { %v2881_v48 = vpop.f32.mrf.mxu1  ;;  %v125_v22 = vadd.f32 %v2840_v26, %v2877_v46 }
  0xb5   :  { %v2892_v53 = vpop.f32.mrf.mxu3 }
  0xb6   :  { %v171_v25 = vadd.f32 %v2881_v48, %v125_v22 }
  0xb8   :  { %v220_v26 = vadd.f32 %v2879_v47, %v171_v25 }
  0xbb   :  { %v297_v63 = vpop.f32.mrf.mxu0  ;;  %v408_v0 = vpop.f32.mrf.mxu2 }
  0xbc   :  { %v298_v1 = vadd.f32 %v297_v63, %v244_v60  ;;  %v339_v2 = vpop.f32.mrf.mxu1 }
  0xbd   :  { %v439_v3 = vpop.f32.mrf.mxu3 }
  0xbe   :  { %v340_v6 = vadd.f32 %v339_v2, %v298_v1  ;;  %v440_v32 = vadd.f32 %v439_v3, %v408_v0  ;;  %v167_v2 = vadd.f32 %v2846_v31, %v117_v21 }
  0xc0   :  { %363 = vst.msk [vmem:[#allocation2] sm:$0xff] %vm362_vm4, %v340_v6  ;;  %v215_v6 = vadd.f32 %v2844_v28, %v167_v2 }
  0xc3   :  { %v301_v10 = vpop.f32.mrf.mxu0  ;;  %v465_v12 = vpop.f32.mrf.mxu2 }
  0xc4   :  { %v302_v33 = vadd.f32 %v301_v10, %v250_v8  ;;  %v343_v35 = vpop.f32.mrf.mxu1  ;;  %v466_v41 = vadd.f32 %v465_v12, %v440_v32  ;;  %v268_v10 = vadd.f32 %v2852_v34, %v215_v6  ;;  %v274_v34 = vadd.f32 %v2892_v53, %v220_v26 }
  0xc5   :  { %v490_v38 = vpop.f32.mrf.mxu3 }
  0xc6   :  { %v344_v42 = vadd.f32 %v343_v35, %v302_v33  ;;  %v491_v17 = vadd.f32 %v490_v38, %v466_v41 }
  0xc7   :  { %v376_v1 = vld [vmem:[#allocation2] sm:$0xff] }
  0xc8   :  { %364 = vst.msk [vmem:[#allocation2 + $0x8] sm:$0xff] %vm362_vm4, %v344_v42 }
  0xcb   :  { %v305_v52 = vpop.f32.mrf.mxu0  ;;  %v517_v54 = vpop.f32.mrf.mxu2 }
  0xcc   :  { %v306_v56 = vadd.f32 %v305_v52, %v256_v49  ;;  %v518_v59 = vadd.f32 %v517_v54, %v491_v17  ;;  %v347_v60 = vpop.f32.mrf.mxu1  ;;  %v2963_v49 = vld [vmem:[%s3142_s6] ss:$0 sm:$0xff] }
  0xcd   :  { %v540_v61 = vpop.f32.mrf.mxu3 }
  0xce   :  { %v348_v63 = vadd.f32 %v347_v60, %v306_v56  ;;  %v541_v0 = vadd.f32 %v540_v61, %v518_v59 }
  0xd0   :  { %365 = vst.msk [vmem:[#allocation2 + $0x10] sm:$0xff] %vm362_vm4, %v348_v63  ;;  %v543_v20 = vadd.f32 %v541_v0, %v376_v1 }
  0xd2   :  { %2610 = vtanh.f32 %v543_v20 }
  0xd3   :  { %v309_v3 = vpop.f32.mrf.mxu0 }
  0xd4   :  { %v310_v4 = vadd.f32 %v309_v3, %v262_v24  ;;  %v351_v5 = vpop.f32.mrf.mxu1 }
  0xd6   :  { %v352_v27 = vadd.f32 %v351_v5, %v310_v4 }
  0xd8   :  { %v2611_v8 = vpop.eup %2610  ;;  %366 = vst.msk [vmem:[#allocation2 + $0x18] sm:$0xff] %vm362_vm4, %v352_v27 }
  0xd9   :  { %v549_v9 = vsel %vm362_vm4, %v2611_v8, 0 }
  0xda   :  { %v574_v31 = vand.u32 4294901760, %v549_v9 }
  0xdb   :  { %v313_v12 = vpop.f32.mrf.mxu0 }
  0xdc   :  { %v314_v32 = vadd.f32 %v313_v12, %v268_v10  ;;  %v355_v33 = vpop.f32.mrf.mxu1  ;;  %v575_v35 = vsub.f32 %v549_v9, %v574_v31  ;;  %615 = vmatmul.f32.vlgmr.msra.gmra.mxu3 %v574_v31 }
  0xdd   :  { %717 = vmatpush.msra.mxu3 %v2854_v36 }
  0xde   :  { %v356_v28 = vadd.f32 %v355_v33, %v314_v32  ;;  %v576_v46 = vand.u32 4294901760, %v575_v35 }
  0xdf   :  { %719 = vmatpush.msra.mxu3 %v2862_v40 }
  0xe0   :  { %367 = vst.msk [vmem:[#allocation2 + $0x20] sm:$0xff] %vm362_vm4, %v356_v28  ;;  %v577_v38 = vsub.f32 %v575_v35, %v576_v46 }
  0xe1   :  { %721 = vmatpush.msra.mxu3 %v2874_v45 }
  0xe2   :  { %v578_v48 = vand.u32 4294901760, %v577_v38 }
  0xe3   :  { %v317_v11 = vpop.f32.mrf.mxu0 }
  0xe4   :  { %v318_v14 = vadd.f32 %v317_v11, %v274_v34  ;;  %v359_v41 = vpop.f32.mrf.mxu1  ;;  %579 = vmatmul.f32.vlgmr.msra.gmra.mxu2 %v578_v48  ;;  %669 = vmatmul.f32.vlgmr.msrb.gmra.mxu3 %v576_v46 }
  0xe5   :  { %689 = vmatpush.msra.mxu2 %v2869_v43  ;;  %856 = vmatpush.msrb.mxu3 %v2728_v7 }
  0xe6   :  { %v360_v47 = vadd.f32 %v359_v41, %v318_v14 }
  0xe7   :  { %693 = vmatpush.msra.mxu2 %v2886_v50  ;;  %858 = vmatpush.msrb.mxu3 %v2747_v18 }
  0xe8   :  { %368 = vst.msk [vmem:[#allocation2 + $0x28] sm:$0xff] %vm362_vm4, %v360_v47 }
  0xe9   :  { %697 = vmatpush.msra.mxu2 %v2901_v57 }
  0xec   :  { %643 = vmatmul.f32.vlgmr.msrb.gmra.mxu2 %v575_v35  ;;  %723 = vmatmul.f32.vlgmr.msra.gmra.mxu3 %v574_v31 }
  0xed   :  { %831 = vmatpush.msrb.mxu2 %v2743_v15  ;;  %967 = vmatpush.msra.mxu3 %v2896_v55 }
  0xef   :  { %834 = vmatpush.msrb.mxu2 %v2754_v23  ;;  %973 = vmatpush.msra.mxu3 %v2905_v58 }
  0xf1   :  { %979 = vmatpush.msra.mxu3 %v2911_v62 }
  0xf4   :  { %699 = vmatmul.f32.vlgmr.msra.gmra.mxu2 %v574_v31 }
  0xf5   :  { %935 = vmatpush.msra.mxu2 %v2854_v36 }
  0xf7   :  { %937 = vmatpush.msra.mxu2 %v2862_v40 }
  0xf9   :  { %939 = vmatpush.msra.mxu2 %v2874_v45 }
 0x15f   :  { %v616_v53 = vpop.f32.mrf.mxu3 }
 0x167   :  { %v580_v42 = vpop.f32.mrf.mxu2  ;;  %v670_v17 = vpop.f32.mrf.mxu3 }
 0x168   :  { %v581_v13 = vadd.f32 %v2963_v49, %v580_v42 }
 0x16a   :  { %v617_v54 = vadd.f32 %v616_v53, %v581_v13 }
 0x16f   :  { %v644_v52 = vpop.f32.mrf.mxu2  ;;  %v724_v16 = vpop.f32.mrf.mxu3 }
 0x170   :  { %v645_v56 = vadd.f32 %v644_v52, %v617_v54  ;;  %v753_v52 = vld [vmem:[#allocation2 + $0x8] sm:$0xff] }
 0x172   :  { %v671_v59 = vadd.f32 %v670_v17, %v645_v56 }
 0x177   :  { %v700_v60 = vpop.f32.mrf.mxu2 }
 0x178   :  { %v701_v61 = vadd.f32 %v700_v60, %v671_v59 }
 0x17a   :  { %v725_v21 = vadd.f32 %v724_v16, %v701_v61 }
 0x17c   :  { %v727_v63 = vsel %vm377_vm2, %v725_v21, -inf }
 0x17d   :  { %728 = vmax.xlane.f32.xlu0 %v727_v63 }
 0x1f0   :  { %v729_v0 = vpop.xlane.xlu0 %728 }
 0x1f1   :  { %v730_v1 = vsub.f32 %v725_v21, %v729_v0 }
 0x1f3   :  { %v731_v20 = vmul.f32 1.442695, %v730_v1 }
 0x1f5   :  { %2612 = vpow2.f32 %v731_v20 }
 0x1fb   :  { %v2613_v24 = vpop.eup %2612 }
 0x1fc   :  { %v733_v2 = vsel %vm377_vm2, %v2613_v24, 0.0 }
 0x1fd   :  { %734 = vadd.xlane.f32.xlu0 %v733_v2 }
 0x270   :  { %v735_v3 = vpop.xlane.xlu0 %734 }
 0x271   :  { %2614 = vrcp.f32 %v735_v3  ;;  %v747_v22 = vand.u32 2147483648, %v735_v3  ;;  %v745_v8 = vand.u32 2147483647, %v735_v3  ;;  %vm741_vm6 = vweird.f32 %v735_v3 }
 0x273   :  { %v748_v10 = vor.u32 1.1754944e-38, %v747_v22  ;;  %vm746_vm8 = vcmp.eq.f32.partialorder %v745_v8, 8.507059e+37 }
 0x277   :  { %v2615_v4 = vpop.eup %2614 }
 0x278   :  { %v737_v5 = vmul.f32 %v2615_v4, %v735_v3  ;;  %vm742_vm5 = vweird.f32 %v2615_v4 }
 0x279   :  { %vm743_vm7 = vmor %vm741_vm6, %vm742_vm5 }
 0x27a   :  { %v738_v6 = vsub.f32 1.0, %v737_v5 }
 0x27c   :  { %v739_v27 = vmul.f32 %v2615_v4, %v738_v6 }
 0x27e   :  { %v740_v9 = vadd.f32 %v2615_v4, %v739_v27 }
 0x280   :  { %v744_v25 = vsel %vm743_vm7, %v2615_v4, %v740_v9 }
 0x281   :  { %v749_v31 = vsel %vm746_vm8, %v748_v10, %v744_v25 }
 0x282   :  { %v750_v12 = vmul.f32 %v2613_v24, %v749_v31 }
 0x284   :  { %751 = vst.msk [vmem:[#allocation3] sm:$0xff] %vm377_vm2, %v750_v12  ;;  %v755_v32 = vsel %vm377_vm2, %v750_v12, 0 }
 0x285   :  { %v775_v33 = vand.u32 4294901760, %v755_v32 }
 0x287   :  { %811 = vmatmul.f32.vlgmr.msra.gmra.mxu1 %v775_v33  ;;  %v776_v35 = vsub.f32 %v755_v32, %v775_v33 }
 0x288   :  { %1027 = vmatpush.msra.mxu1 %v2854_v36 }
 0x289   :  { %837 = vmatmul.f32.vlgmr.msrb.gmra.mxu2 %v776_v35  ;;  %v777_v26 = vand.u32 4294901760, %v776_v35 }
 0x28a   :  { %1029 = vmatpush.msra.mxu1 %v2862_v40  ;;  %1055 = vmatpush.msrb.mxu2 %v2869_v43 }
 0x28b   :  { %862 = vmatmul.f32.vlgmr.msrb.gmra.mxu3 %v777_v26  ;;  %v778_v28 = vsub.f32 %v776_v35, %v777_v26 }
 0x28c   :  { %1031 = vmatpush.msra.mxu1 %v2874_v45  ;;  %1083 = vmatpush.msrb.mxu3 %v2854_v36 }
 0x28d   :  { %v779_v46 = vand.u32 4294901760, %v778_v28  ;;  %1059 = vmatpush.msrb.mxu2 %v2886_v50 }
 0x28e   :  { %1085 = vmatpush.msrb.mxu3 %v2862_v40 }
 0x28f   :  { %780 = vmatmul.f32.vlgmr.msra.gmra.mxu0 %v779_v46  ;;  %912 = vmatmul.f32.vlgmr.msrb.gmra.mxu1 %v775_v33 }
 0x290   :  { %1000 = vmatpush.msra.mxu0 %v2860_v39  ;;  %1087 = vmatpush.msrb.mxu3 %v2874_v45 }
 0x291   :  { %1063 = vmatpush.msrb.mxu2 %v2901_v57  ;;  %1170 = vmatpush.msrb.mxu1 %v2764_v30 }
 0x292   :  { %1003 = vmatpush.msra.mxu0 %v2872_v44 }
 0x293   :  { %1176 = vmatpush.msrb.mxu1 %v2776_v37 }
 0x294   :  { %1006 = vmatpush.msra.mxu0 %v2889_v51 }
 0x297   :  { %889 = vmatmul.f32.vlgmr.msrb.gmra.mxu0 %v775_v33 }
 0x298   :  { %1139 = vmatpush.msrb.mxu0 %v2728_v7 }
 0x29a   :  { %1141 = vmatpush.msrb.mxu0 %v2747_v18 }
 0x304   :  { %v812_v38 = vpop.f32.mrf.mxu1 }
 0x30c   :  { %v781_v34 = vpop.f32.mrf.mxu0  ;;  %v838_v11 = vpop.f32.mrf.mxu2 }
 0x30d   :  { %v813_v48 = vadd.f32 %v812_v38, %v781_v34  ;;  %v913_v13 = vpop.f32.mrf.mxu1 }
 0x30e   :  { %v863_v41 = vpop.f32.mrf.mxu3 }
 0x30f   :  { %v839_v14 = vadd.f32 %v838_v11, %v813_v48 }
 0x311   :  { %v864_v47 = vadd.f32 %v863_v41, %v839_v14 }
 0x314   :  { %v890_v53 = vpop.f32.mrf.mxu0 }
 0x315   :  { %v891_v42 = vadd.f32 %v890_v53, %v864_v47 }
 0x317   :  { %v914_v17 = vadd.f32 %v913_v13, %v891_v42 }
 0x319   :  { %v916_v54 = vadd.f32 %v914_v17, %v753_v52 }
 0x31b   :  { %2616 = vtanh.f32 %v916_v54 }
 0x321   :  { %v2617_v56 = vpop.eup %2616 }
 0x322   :  { %v919_v59 = vsel %vm362_vm4, %v2617_v56, 0 }
 0x323   :  { %v940_v60 = vand.u32 4294901760, %v919_v59 }
 0x325   :  { %981 = vmatmul.f32.vlgmr.msra.gmra.mxu3 %v940_v60  ;;  %v941_v61 = vsub.f32 %v919_v59, %v940_v60 }
 0x326   :  { %1223 = vmatpush.msra.mxu3 %v2728_v7 }
 0x327   :  { %1009 = vmatmul.f32.vlgmr.msra.gmra.mxu0 %v941_v61  ;;  %v942_v16 = vand.u32 4294901760, %v941_v61 }
 0x328   :  { %1225 = vmatpush.msra.mxu3 %v2747_v18  ;;  %1250 = vmatpush.msra.mxu0 %v2750_v19 }
 0x329   :  { %1035 = vmatmul.f32.vlgmr.msra.gmra.mxu1 %v942_v16  ;;  %v943_v21 = vsub.f32 %v941_v61, %v942_v16 }
 0x32a   :  { %1275 = vmatpush.msra.mxu1 %v2728_v7  ;;  %1254 = vmatpush.msra.mxu0 %v2762_v29 }
 0x32b   :  { %v944_v63 = vand.u32 4294901760, %v943_v21 }
 0x32c   :  { %1277 = vmatpush.msra.mxu1 %v2747_v18 }
 0x32d   :  { %945 = vmatmul.f32.vlgmr.msra.gmra.mxu2 %v944_v63  ;;  %1089 = vmatmul.f32.vlgmr.msrb.gmra.mxu3 %v940_v60 }
 0x32e   :  { %1198 = vmatpush.msra.mxu2 %v2743_v15  ;;  %1334 = vmatpush.msrb.mxu3 %v2896_v55 }
 0x330   :  { %1201 = vmatpush.msra.mxu2 %v2754_v23  ;;  %1340 = vmatpush.msrb.mxu3 %v2905_v58 }
 0x332   :  { %1346 = vmatpush.msrb.mxu3 %v2911_v62 }
 0x335   :  { %1065 = vmatmul.f32.vlgmr.msrb.gmra.mxu2 %v940_v60 }
 0x336   :  { %1302 = vmatpush.msrb.mxu2 %v2854_v36 }
 0x338   :  { %1304 = vmatpush.msrb.mxu2 %v2862_v40 }
 0x33a   :  { %1306 = vmatpush.msrb.mxu2 %v2874_v45 }
 0x3a4   :  { %v1010_v2 = vpop.f32.mrf.mxu0 }
 0x3a6   :  { %v1036_v4 = vpop.f32.mrf.mxu1 }
 0x3a8   :  { %v982_v0 = vpop.f32.mrf.mxu3 }
 0x3b0   :  { %v946_v1 = vpop.f32.mrf.mxu2  ;;  %v1090_v27 = vpop.f32.mrf.mxu3 }
 0x3b1   :  { %v947_v20 = vadd.f32 %v2963_v49, %v946_v1 }
 0x3b3   :  { %v983_v24 = vadd.f32 %v982_v0, %v947_v20 }
 0x3b5   :  { %v1011_v3 = vadd.f32 %v1010_v2, %v983_v24  ;;  %v1120_v2 = vld [vmem:[#allocation2 + $0x10] sm:$0xff] }
 0x3b7   :  { %v1037_v5 = vadd.f32 %v1036_v4, %v1011_v3 }
 0x3b8   :  { %v1066_v6 = vpop.f32.mrf.mxu2 }
 0x3b9   :  { %v1067_v22 = vadd.f32 %v1066_v6, %v1037_v5 }
 0x3bb   :  { %v1091_v8 = vadd.f32 %v1090_v27, %v1067_v22 }
 0x3bd   :  { %v1093_v9 = vsel %vm377_vm2, %v1091_v8, -inf }
 0x3be   :  { %1094 = vmax.xlane.f32.xlu1 %v1093_v9 }
 0x431   :  { %v1095_v10 = vpop.xlane.xlu1 %1094 }
 0x432   :  { %v1096_v25 = vsub.f32 %v1091_v8, %v1095_v10 }
 0x434   :  { %v1097_v31 = vmul.f32 1.442695, %v1096_v25 }
 0x436   :  { %2618 = vpow2.f32 %v1097_v31 }
 0x43c   :  { %v2619_v12 = vpop.eup %2618 }
 0x43d   :  { %v1099_v32 = vsel %vm377_vm2, %v2619_v12, 0.0 }
 0x43e   :  { %1100 = vadd.xlane.f32.xlu1 %v1099_v32 }
 0x4b1   :  { %v1101_v33 = vpop.xlane.xlu1 %1100 }
 0x4b2   :  { %2620 = vrcp.f32 %v1101_v33  ;;  %v1113_v46 = vand.u32 2147483648, %v1101_v33  ;;  %v1111_v34 = vand.u32 2147483647, %v1101_v33  ;;  %vm1107_vm10 = vweird.f32 %v1101_v33 }
 0x4b4   :  { %v1114_v11 = vor.u32 1.1754944e-38, %v1113_v46  ;;  %vm1112_vm12 = vcmp.eq.f32.partialorder %v1111_v34, 8.507059e+37 }
 0x4b8   :  { %v2621_v35 = vpop.eup %2620 }
 0x4b9   :  { %v1103_v26 = vmul.f32 %v2621_v35, %v1101_v33  ;;  %vm1108_vm9 = vweird.f32 %v2621_v35 }
 0x4ba   :  { %vm1109_vm11 = vmor %vm1107_vm10, %vm1108_vm9 }
 0x4bb   :  { %v1104_v28 = vsub.f32 1.0, %v1103_v26 }
 0x4bd   :  { %v1105_v38 = vmul.f32 %v2621_v35, %v1104_v28 }
 0x4bf   :  { %v1106_v48 = vadd.f32 %v2621_v35, %v1105_v38 }
 0x4c1   :  { %v1110_v14 = vsel %vm1109_vm11, %v2621_v35, %v1106_v48 }
 0x4c2   :  { %v1115_v41 = vsel %vm1112_vm12, %v1114_v11, %v1110_v14 }
 0x4c3   :  { %v1116_v47 = vmul.f32 %v2619_v12, %v1115_v41 }
 0x4c5   :  { %1118 = vst.msk [vmem:[#allocation3 + $0x8] sm:$0xff] %vm377_vm2, %v1116_v47  ;;  %v1122_v53 = vsel %vm377_vm2, %v1116_v47, 0 }
 0x4c6   :  { %v1142_v42 = vand.u32 4294901760, %v1122_v53 }
 0x4c8   :  { %1178 = vmatmul.f32.vlgmr.msrb.gmra.mxu1 %v1142_v42  ;;  %v1143_v13 = vsub.f32 %v1122_v53, %v1142_v42 }
 0x4c9   :  { %1394 = vmatpush.msrb.mxu1 %v2854_v36 }
 0x4ca   :  { %1204 = vmatmul.f32.vlgmr.msra.gmra.mxu2 %v1143_v13  ;;  %v1144_v17 = vand.u32 4294901760, %v1143_v13 }
 0x4cb   :  { %1396 = vmatpush.msrb.mxu1 %v2862_v40  ;;  %1422 = vmatpush.msra.mxu2 %v2869_v43 }
 0x4cc   :  { %1229 = vmatmul.f32.vlgmr.msra.gmra.mxu3 %v1144_v17  ;;  %v1145_v52 = vsub.f32 %v1143_v13, %v1144_v17 }
 0x4cd   :  { %1398 = vmatpush.msrb.mxu1 %v2874_v45  ;;  %1450 = vmatpush.msra.mxu3 %v2854_v36 }
 0x4ce   :  { %v1146_v54 = vand.u32 4294901760, %v1145_v52  ;;  %1426 = vmatpush.msra.mxu2 %v2886_v50 }
 0x4cf   :  { %1452 = vmatpush.msra.mxu3 %v2862_v40 }
 0x4d0   :  { %1147 = vmatmul.f32.vlgmr.msrb.gmra.mxu0 %v1146_v54  ;;  %1279 = vmatmul.f32.vlgmr.msra.gmra.mxu1 %v1142_v42 }
 0x4d1   :  { %1367 = vmatpush.msrb.mxu0 %v2860_v39  ;;  %1454 = vmatpush.msra.mxu3 %v2874_v45 }
 0x4d2   :  { %1430 = vmatpush.msra.mxu2 %v2901_v57  ;;  %1537 = vmatpush.msra.mxu1 %v2764_v30 }
 0x4d3   :  { %1370 = vmatpush.msrb.mxu0 %v2872_v44 }
 0x4d4   :  { %1543 = vmatpush.msra.mxu1 %v2776_v37 }
 0x4d5   :  { %1373 = vmatpush.msrb.mxu0 %v2889_v51 }
 0x4d8   :  { %1256 = vmatmul.f32.vlgmr.msra.gmra.mxu0 %v1142_v42 }
 0x4d9   :  { %1506 = vmatpush.msra.mxu0 %v2728_v7 }
 0x4db   :  { %1508 = vmatpush.msra.mxu0 %v2747_v18 }
 0x545   :  { %v1179_v56 = vpop.f32.mrf.mxu1 }
 0x54d   :  { %v1148_v59 = vpop.f32.mrf.mxu0  ;;  %v1205_v61 = vpop.f32.mrf.mxu2 }
 0x54e   :  { %v1180_v60 = vadd.f32 %v1179_v56, %v1148_v59  ;;  %v1280_v20 = vpop.f32.mrf.mxu1 }
 0x54f   :  { %v1230_v21 = vpop.f32.mrf.mxu3 }
 0x550   :  { %v1206_v16 = vadd.f32 %v1205_v61, %v1180_v60 }
 0x552   :  { %v1231_v63 = vadd.f32 %v1230_v21, %v1206_v16 }
 0x555   :  { %v1257_v0 = vpop.f32.mrf.mxu0 }
 0x556   :  { %v1258_v1 = vadd.f32 %v1257_v0, %v1231_v63 }
 0x558   :  { %v1281_v24 = vadd.f32 %v1280_v20, %v1258_v1 }
 0x55a   :  { %v1283_v3 = vadd.f32 %v1281_v24, %v1120_v2 }
 0x55c   :  { %2622 = vtanh.f32 %v1283_v3 }
 0x562   :  { %v2623_v4 = vpop.eup %2622 }
 0x563   :  { %v1286_v5 = vsel %vm362_vm4, %v2623_v4, 0 }
 0x564   :  { %v1307_v6 = vand.u32 4294901760, %v1286_v5 }
 0x566   :  { %1348 = vmatmul.f32.vlgmr.msrb.gmra.mxu3 %v1307_v6  ;;  %v1308_v22 = vsub.f32 %v1286_v5, %v1307_v6 }
 0x567   :  { %1590 = vmatpush.msrb.mxu3 %v2728_v7 }
 0x568   :  { %1376 = vmatmul.f32.vlgmr.msrb.gmra.mxu0 %v1308_v22  ;;  %v1309_v27 = vand.u32 4294901760, %v1308_v22 }
 0x569   :  { %1592 = vmatpush.msrb.mxu3 %v2747_v18  ;;  %1617 = vmatpush.msrb.mxu0 %v2750_v19 }
 0x56a   :  { %1402 = vmatmul.f32.vlgmr.msrb.gmra.mxu1 %v1309_v27  ;;  %v1310_v8 = vsub.f32 %v1308_v22, %v1309_v27 }
 0x56b   :  { %1642 = vmatpush.msrb.mxu1 %v2728_v7  ;;  %1621 = vmatpush.msrb.mxu0 %v2762_v29 }
 0x56c   :  { %v1311_v9 = vand.u32 4294901760, %v1310_v8 }
 0x56d   :  { %1644 = vmatpush.msrb.mxu1 %v2747_v18 }
 0x56e   :  { %1312 = vmatmul.f32.vlgmr.msrb.gmra.mxu2 %v1311_v9  ;;  %1456 = vmatmul.f32.vlgmr.msra.gmra.mxu3 %v1307_v6 }
 0x56f   :  { %1565 = vmatpush.msrb.mxu2 %v2743_v15  ;;  %1701 = vmatpush.msra.mxu3 %v2896_v55 }
 0x571   :  { %1568 = vmatpush.msrb.mxu2 %v2754_v23  ;;  %1707 = vmatpush.msra.mxu3 %v2905_v58 }
 0x573   :  { %1713 = vmatpush.msra.mxu3 %v2911_v62 }
 0x576   :  { %1432 = vmatmul.f32.vlgmr.msra.gmra.mxu2 %v1307_v6 }
 0x577   :  { %1669 = vmatpush.msra.mxu2 %v2854_v36 }
 0x579   :  { %1671 = vmatpush.msra.mxu2 %v2862_v40 }
 0x57b   :  { %1673 = vmatpush.msra.mxu2 %v2874_v45 }
 0x5e5   :  { %v1377_v32 = vpop.f32.mrf.mxu0 }
 0x5e7   :  { %v1403_v35 = vpop.f32.mrf.mxu1 }
 0x5e9   :  { %v1349_v10 = vpop.f32.mrf.mxu3 }
 0x5f1   :  { %v1313_v25 = vpop.f32.mrf.mxu2  ;;  %v1457_v38 = vpop.f32.mrf.mxu3 }
 0x5f2   :  { %v1314_v31 = vadd.f32 %v2963_v49, %v1313_v25 }
 0x5f4   :  { %v1350_v12 = vadd.f32 %v1349_v10, %v1314_v31 }
 0x5f6   :  { %v1378_v33 = vadd.f32 %v1377_v32, %v1350_v12  ;;  %v1487_v32 = vld [vmem:[#allocation2 + $0x18] sm:$0xff] }
 0x5f8   :  { %v1404_v26 = vadd.f32 %v1403_v35, %v1378_v33 }
 0x5f9   :  { %v1433_v28 = vpop.f32.mrf.mxu2 }
 0x5fa   :  { %v1434_v46 = vadd.f32 %v1433_v28, %v1404_v26 }
 0x5fc   :  { %v1458_v34 = vadd.f32 %v1457_v38, %v1434_v46 }
 0x5fe   :  { %v1460_v48 = vsel %vm377_vm2, %v1458_v34, -inf }
 0x5ff   :  { %1461 = vmax.xlane.f32.xlu2 %v1460_v48 }
 0x672   :  { %v1462_v11 = vpop.xlane.xlu2 %1461 }
 0x673   :  { %v1463_v14 = vsub.f32 %v1458_v34, %v1462_v11 }
 0x675   :  { %v1464_v41 = vmul.f32 1.442695, %v1463_v14 }
 0x677   :  { %2624 = vpow2.f32 %v1464_v41 }
 0x67d   :  { %v2625_v47 = vpop.eup %2624 }
 0x67e   :  { %v1466_v53 = vsel %vm377_vm2, %v2625_v47, 0.0 }
 0x67f   :  { %1467 = vadd.xlane.f32.xlu2 %v1466_v53 }
 0x6f2   :  { %v1468_v42 = vpop.xlane.xlu2 %1467 }
 0x6f3   :  { %2626 = vrcp.f32 %v1468_v42  ;;  %v1480_v54 = vand.u32 2147483648, %v1468_v42  ;;  %v1478_v59 = vand.u32 2147483647, %v1468_v42  ;;  %vm1474_vm14 = vweird.f32 %v1468_v42 }
 0x6f5   :  { %v1481_v61 = vor.u32 1.1754944e-38, %v1480_v54  ;;  %vm1479_vm0 = vcmp.eq.f32.partialorder %v1478_v59, 8.507059e+37 }
 0x6f9   :  { %v2627_v13 = vpop.eup %2626 }
 0x6fa   :  { %v1470_v17 = vmul.f32 %v2627_v13, %v1468_v42  ;;  %vm1475_vm13 = vweird.f32 %v2627_v13 }
 0x6fb   :  { %vm1476_vm15 = vmor %vm1474_vm14, %vm1475_vm13 }
 0x6fc   :  { %v1471_v52 = vsub.f32 1.0, %v1470_v17 }
 0x6fe   :  { %v1472_v56 = vmul.f32 %v2627_v13, %v1471_v52 }
 0x700   :  { %v1473_v60 = vadd.f32 %v2627_v13, %v1472_v56 }
 0x702   :  { %v1477_v16 = vsel %vm1476_vm15, %v2627_v13, %v1473_v60 }
 0x703   :  { %v1482_v21 = vsel %vm1479_vm0, %v1481_v61, %v1477_v16 }
 0x704   :  { %v1483_v63 = vmul.f32 %v2625_v47, %v1482_v21 }
 0x706   :  { %1485 = vst.msk [vmem:[#allocation3 + $0x10] sm:$0xff] %vm377_vm2, %v1483_v63  ;;  %v1489_v0 = vsel %vm377_vm2, %v1483_v63, 0 }
 0x707   :  { %v1509_v1 = vand.u32 4294901760, %v1489_v0 }
 0x709   :  { %1545 = vmatmul.f32.vlgmr.msra.gmra.mxu1 %v1509_v1  ;;  %v1510_v20 = vsub.f32 %v1489_v0, %v1509_v1 }
 0x70a   :  { %1761 = vmatpush.msra.mxu1 %v2854_v36 }
 0x70b   :  { %1571 = vmatmul.f32.vlgmr.msrb.gmra.mxu2 %v1510_v20  ;;  %v1511_v24 = vand.u32 4294901760, %v1510_v20 }
 0x70c   :  { %1763 = vmatpush.msra.mxu1 %v2862_v40  ;;  %1789 = vmatpush.msrb.mxu2 %v2869_v43 }
 0x70d   :  { %1596 = vmatmul.f32.vlgmr.msrb.gmra.mxu3 %v1511_v24  ;;  %v1512_v2 = vsub.f32 %v1510_v20, %v1511_v24 }
 0x70e   :  { %1765 = vmatpush.msra.mxu1 %v2874_v45  ;;  %1817 = vmatpush.msrb.mxu3 %v2854_v36 }
 0x70f   :  { %v1513_v3 = vand.u32 4294901760, %v1512_v2  ;;  %1793 = vmatpush.msrb.mxu2 %v2886_v50 }
 0x710   :  { %1819 = vmatpush.msrb.mxu3 %v2862_v40 }
 0x711   :  { %1514 = vmatmul.f32.vlgmr.msra.gmra.mxu0 %v1513_v3  ;;  %1646 = vmatmul.f32.vlgmr.msrb.gmra.mxu1 %v1509_v1 }
 0x712   :  { %1734 = vmatpush.msra.mxu0 %v2860_v39  ;;  %1821 = vmatpush.msrb.mxu3 %v2874_v45 }
 0x713   :  { %1797 = vmatpush.msrb.mxu2 %v2901_v57  ;;  %1904 = vmatpush.msrb.mxu1 %v2764_v30 }
 0x714   :  { %1737 = vmatpush.msra.mxu0 %v2872_v44 }
 0x715   :  { %1910 = vmatpush.msrb.mxu1 %v2776_v37 }
 0x716   :  { %1740 = vmatpush.msra.mxu0 %v2889_v51 }
 0x719   :  { %1623 = vmatmul.f32.vlgmr.msrb.gmra.mxu0 %v1509_v1 }
 0x71a   :  { %1873 = vmatpush.msrb.mxu0 %v2728_v7 }
 0x71c   :  { %1875 = vmatpush.msrb.mxu0 %v2747_v18 }
 0x786   :  { %v1546_v4 = vpop.f32.mrf.mxu1 }
 0x78e   :  { %v1515_v5 = vpop.f32.mrf.mxu0  ;;  %v1572_v22 = vpop.f32.mrf.mxu2 }
 0x78f   :  { %v1547_v6 = vadd.f32 %v1546_v4, %v1515_v5  ;;  %v1647_v31 = vpop.f32.mrf.mxu1 }
 0x790   :  { %v1597_v8 = vpop.f32.mrf.mxu3 }
 0x791   :  { %v1573_v27 = vadd.f32 %v1572_v22, %v1547_v6 }
 0x793   :  { %v1598_v9 = vadd.f32 %v1597_v8, %v1573_v27 }
 0x796   :  { %v1624_v10 = vpop.f32.mrf.mxu0 }
 0x797   :  { %v1625_v25 = vadd.f32 %v1624_v10, %v1598_v9 }
 0x799   :  { %v1648_v12 = vadd.f32 %v1647_v31, %v1625_v25 }
 0x79b   :  { %v1650_v33 = vadd.f32 %v1648_v12, %v1487_v32 }
 0x79d   :  { %2628 = vtanh.f32 %v1650_v33 }
 0x7a3   :  { %v2629_v35 = vpop.eup %2628 }
 0x7a4   :  { %v1653_v26 = vsel %vm362_vm4, %v2629_v35, 0 }
 0x7a5   :  { %v1674_v28 = vand.u32 4294901760, %v1653_v26 }
 0x7a7   :  { %1715 = vmatmul.f32.vlgmr.msra.gmra.mxu3 %v1674_v28  ;;  %v1675_v46 = vsub.f32 %v1653_v26, %v1674_v28 }
 0x7a8   :  { %1957 = vmatpush.msra.mxu3 %v2728_v7 }
 0x7a9   :  { %1743 = vmatmul.f32.vlgmr.msra.gmra.mxu0 %v1675_v46  ;;  %v1676_v38 = vand.u32 4294901760, %v1675_v46 }
 0x7aa   :  { %1959 = vmatpush.msra.mxu3 %v2747_v18  ;;  %1984 = vmatpush.msra.mxu0 %v2750_v19 }
 0x7ab   :  { %1769 = vmatmul.f32.vlgmr.msra.gmra.mxu1 %v1676_v38  ;;  %v1677_v34 = vsub.f32 %v1675_v46, %v1676_v38 }
 0x7ac   :  { %2009 = vmatpush.msra.mxu1 %v2728_v7  ;;  %1988 = vmatpush.msra.mxu0 %v2762_v29 }
 0x7ad   :  { %v1678_v48 = vand.u32 4294901760, %v1677_v34 }
 0x7ae   :  { %2011 = vmatpush.msra.mxu1 %v2747_v18 }
 0x7af   :  { %1679 = vmatmul.f32.vlgmr.msra.gmra.mxu2 %v1678_v48  ;;  %1823 = vmatmul.f32.vlgmr.msrb.gmra.mxu3 %v1674_v28 }
 0x7b0   :  { %1932 = vmatpush.msra.mxu2 %v2743_v15  ;;  %2068 = vmatpush.msrb.mxu3 %v2896_v55 }
 0x7b2   :  { %1935 = vmatpush.msra.mxu2 %v2754_v23  ;;  %2074 = vmatpush.msrb.mxu3 %v2905_v58 }
 0x7b4   :  { %2080 = vmatpush.msrb.mxu3 %v2911_v62 }
 0x7b7   :  { %1799 = vmatmul.f32.vlgmr.msrb.gmra.mxu2 %v1674_v28 }
 0x7b8   :  { %2036 = vmatpush.msrb.mxu2 %v2854_v36 }
 0x7ba   :  { %2038 = vmatpush.msrb.mxu2 %v2862_v40 }
 0x7bc   :  { %2040 = vmatpush.msrb.mxu2 %v2874_v45 }
 0x826   :  { %v1744_v53 = vpop.f32.mrf.mxu0 }
 0x828   :  { %v1770_v13 = vpop.f32.mrf.mxu1 }
 0x82a   :  { %v1716_v11 = vpop.f32.mrf.mxu3 }
 0x832   :  { %v1680_v14 = vpop.f32.mrf.mxu2  ;;  %v1824_v56 = vpop.f32.mrf.mxu3 }
 0x833   :  { %v1681_v41 = vadd.f32 %v2963_v49, %v1680_v14 }
 0x835   :  { %v1717_v47 = vadd.f32 %v1716_v11, %v1681_v41 }
 0x837   :  { %v1745_v42 = vadd.f32 %v1744_v53, %v1717_v47  ;;  %v1854_v47 = vld [vmem:[#allocation2 + $0x20] sm:$0xff] }
 0x839   :  { %v1771_v17 = vadd.f32 %v1770_v13, %v1745_v42 }
 0x83a   :  { %v1800_v52 = vpop.f32.mrf.mxu2 }
 0x83b   :  { %v1801_v54 = vadd.f32 %v1800_v52, %v1771_v17 }
 0x83d   :  { %v1825_v59 = vadd.f32 %v1824_v56, %v1801_v54 }
 0x83f   :  { %v1827_v60 = vsel %vm377_vm2, %v1825_v59, -inf }
 0x840   :  { %1828 = vmax.xlane.f32.xlu0 %v1827_v60 }
 0x8b3   :  { %v1829_v61 = vpop.xlane.xlu0 %1828 }
 0x8b4   :  { %v1830_v16 = vsub.f32 %v1825_v59, %v1829_v61 }
 0x8b6   :  { %v1831_v21 = vmul.f32 1.442695, %v1830_v16 }
 0x8b8   :  { %2630 = vpow2.f32 %v1831_v21 }
 0x8be   :  { %v2631_v63 = vpop.eup %2630 }
 0x8bf   :  { %v1833_v0 = vsel %vm377_vm2, %v2631_v63, 0.0 }
 0x8c0   :  { %1834 = vadd.xlane.f32.xlu1 %v1833_v0 }
 0x933   :  { %v1835_v1 = vpop.xlane.xlu1 %1834 }
 0x934   :  { %2632 = vrcp.f32 %v1835_v1  ;;  %v1847_v3 = vand.u32 2147483648, %v1835_v1  ;;  %v1845_v5 = vand.u32 2147483647, %v1835_v1  ;;  %vm1841_vm3 = vweird.f32 %v1835_v1 }
 0x936   :  { %v1848_v22 = vor.u32 1.1754944e-38, %v1847_v3  ;;  %vm1846_vm6 = vcmp.eq.f32.partialorder %v1845_v5, 8.507059e+37 }
 0x93a   :  { %v2633_v20 = vpop.eup %2632 }
 0x93b   :  { %v1837_v24 = vmul.f32 %v2633_v20, %v1835_v1  ;;  %vm1842_vm1 = vweird.f32 %v2633_v20 }
 0x93c   :  { %vm1843_vm5 = vmor %vm1841_vm3, %vm1842_vm1 }
 0x93d   :  { %v1838_v2 = vsub.f32 1.0, %v1837_v24 }
 0x93f   :  { %v1839_v4 = vmul.f32 %v2633_v20, %v1838_v2 }
 0x941   :  { %v1840_v6 = vadd.f32 %v2633_v20, %v1839_v4 }
 0x943   :  { %v1844_v27 = vsel %vm1843_vm5, %v2633_v20, %v1840_v6 }
 0x944   :  { %v1849_v8 = vsel %vm1846_vm6, %v1848_v22, %v1844_v27 }
 0x945   :  { %v1850_v9 = vmul.f32 %v2631_v63, %v1849_v8 }
 0x947   :  { %1852 = vst.msk [vmem:[#allocation3 + $0x18] sm:$0xff] %vm377_vm2, %v1850_v9  ;;  %v1856_v10 = vsel %vm377_vm2, %v1850_v9, 0 }
 0x948   :  { %v1876_v25 = vand.u32 4294901760, %v1856_v10 }
 0x94a   :  { %1912 = vmatmul.f32.vlgmr.msrb.gmra.mxu1 %v1876_v25  ;;  %v1877_v31 = vsub.f32 %v1856_v10, %v1876_v25 }
 0x94b   :  { %2128 = vmatpush.msrb.mxu1 %v2854_v36 }
 0x94c   :  { %1938 = vmatmul.f32.vlgmr.msra.gmra.mxu2 %v1877_v31  ;;  %v1878_v12 = vand.u32 4294901760, %v1877_v31 }
 0x94d   :  { %2130 = vmatpush.msrb.mxu1 %v2862_v40  ;;  %2156 = vmatpush.msra.mxu2 %v2869_v43 }
 0x94e   :  { %1963 = vmatmul.f32.vlgmr.msra.gmra.mxu3 %v1878_v12  ;;  %v1879_v32 = vsub.f32 %v1877_v31, %v1878_v12 }
 0x94f   :  { %2132 = vmatpush.msrb.mxu1 %v2874_v45  ;;  %2184 = vmatpush.msra.mxu3 %v2854_v36 }
 0x950   :  { %v1880_v33 = vand.u32 4294901760, %v1879_v32  ;;  %2160 = vmatpush.msra.mxu2 %v2886_v50 }
 0x951   :  { %2186 = vmatpush.msra.mxu3 %v2862_v40 }
 0x952   :  { %1881 = vmatmul.f32.vlgmr.msrb.gmra.mxu0 %v1880_v33  ;;  %2013 = vmatmul.f32.vlgmr.msra.gmra.mxu1 %v1876_v25 }
 0x953   :  { %2101 = vmatpush.msrb.mxu0 %v2860_v39  ;;  %2188 = vmatpush.msra.mxu3 %v2874_v45 }
 0x954   :  { %2164 = vmatpush.msra.mxu2 %v2901_v57  ;;  %2271 = vmatpush.msra.mxu1 %v2764_v30 }
 0x955   :  { %2104 = vmatpush.msrb.mxu0 %v2872_v44 }
 0x956   :  { %2277 = vmatpush.msra.mxu1 %v2776_v37 }
 0x957   :  { %2107 = vmatpush.msrb.mxu0 %v2889_v51 }
 0x95a   :  { %1990 = vmatmul.f32.vlgmr.msra.gmra.mxu0 %v1876_v25 }
 0x95b   :  { %2240 = vmatpush.msra.mxu0 %v2728_v7 }
 0x95d   :  { %2242 = vmatpush.msra.mxu0 %v2747_v18 }
 0x9c7   :  { %v1913_v35 = vpop.f32.mrf.mxu1 }
 0x9cf   :  { %v1882_v26 = vpop.f32.mrf.mxu0  ;;  %v1939_v46 = vpop.f32.mrf.mxu2 }
 0x9d0   :  { %v1914_v28 = vadd.f32 %v1913_v35, %v1882_v26  ;;  %v2014_v14 = vpop.f32.mrf.mxu1 }
 0x9d1   :  { %v1964_v34 = vpop.f32.mrf.mxu3 }
 0x9d2   :  { %v1940_v38 = vadd.f32 %v1939_v46, %v1914_v28 }
 0x9d4   :  { %v1965_v48 = vadd.f32 %v1964_v34, %v1940_v38 }
 0x9d7   :  { %v1991_v11 = vpop.f32.mrf.mxu0 }
 0x9d8   :  { %v1992_v30 = vadd.f32 %v1991_v11, %v1965_v48  ;;  %v2221_v11 = vld [vmem:[#allocation2 + $0x28] sm:$0xff] }
 0x9da   :  { %v2015_v41 = vadd.f32 %v2014_v14, %v1992_v30 }
 0x9dc   :  { %v2017_v37 = vadd.f32 %v2015_v41, %v1854_v47 }
 0x9de   :  { %2634 = vtanh.f32 %v2017_v37 }
 0x9e4   :  { %v2635_v53 = vpop.eup %2634 }
 0x9e5   :  { %v2020_v42 = vsel %vm362_vm4, %v2635_v53, 0 }
 0x9e6   :  { %v2041_v13 = vand.u32 4294901760, %v2020_v42 }
 0x9e8   :  { %2082 = vmatmul.f32.vlgmr.msrb.gmra.mxu3 %v2041_v13  ;;  %v2042_v17 = vsub.f32 %v2020_v42, %v2041_v13  ;;  %v2646_v42 = vld [vmem:[%s3142_s6] ss:$0 sm:$0xff]  ;;  %s2673_s6 = smov [#allocation3]  }
 0x9e9   :  { %2324 = vmatpush.msrb.mxu3 %v2728_v7  ;;  %s2591_s27 = sshll.u32 %s2673_s6, 4  ;;  %s2592_s27 = int_to_ptr.vmem [resolvable:$true] %s2591_s27 }
 0x9ea   :  { %2110 = vmatmul.f32.vlgmr.msrb.gmra.mxu0 %v2042_v17  ;;  %v2043_v52 = vand.u32 4294901760, %v2042_v17 }
 0x9eb   :  { %2326 = vmatpush.msrb.mxu3 %v2747_v18  ;;  %2351 = vmatpush.msrb.mxu0 %v2750_v19 }
 0x9ec   :  { %2136 = vmatmul.f32.vlgmr.msrb.gmra.mxu1 %v2043_v52  ;;  %v2044_v54 = vsub.f32 %v2042_v17, %v2043_v52 }
 0x9ed   :  { %2376 = vmatpush.msrb.mxu1 %v2728_v7  ;;  %2355 = vmatpush.msrb.mxu0 %v2762_v29 }
 0x9ee   :  { %v2045_v56 = vand.u32 4294901760, %v2044_v54 }
 0x9ef   :  { %2378 = vmatpush.msrb.mxu1 %v2747_v18 }
 0x9f0   :  { %2046 = vmatmul.f32.vlgmr.msrb.gmra.mxu2 %v2045_v56  ;;  %2190 = vmatmul.f32.vlgmr.msra.gmra.mxu3 %v2041_v13 }
 0x9f1   :  { %2299 = vmatpush.msrb.mxu2 %v2743_v15  ;;  %2435 = vmatpush.msra.mxu3 %v2896_v55 }
 0x9f3   :  { %2302 = vmatpush.msrb.mxu2 %v2754_v23  ;;  %2441 = vmatpush.msra.mxu3 %v2905_v58 }
 0x9f5   :  { %2447 = vmatpush.msra.mxu3 %v2911_v62 }
 0x9f8   :  { %2166 = vmatmul.f32.vlgmr.msra.gmra.mxu2 %v2041_v13 }
 0x9f9   :  { %2403 = vmatpush.msra.mxu2 %v2854_v36 }
 0x9fb   :  { %2405 = vmatpush.msra.mxu2 %v2862_v40 }
 0x9fd   :  { %2407 = vmatpush.msra.mxu2 %v2874_v45 }
 0xa67   :  { %v2111_v29 = vpop.f32.mrf.mxu0 }
 0xa69   :  { %v2137_v59 = vpop.f32.mrf.mxu1 }
 0xa6b   :  { %v2083_v7 = vpop.f32.mrf.mxu3 }
 0xa73   :  { %v2047_v18 = vpop.f32.mrf.mxu2  ;;  %v2191_v61 = vpop.f32.mrf.mxu3 }
 0xa74   :  { %v2048_v19 = vadd.f32 %v2963_v49, %v2047_v18 }
 0xa76   :  { %v2084_v15 = vadd.f32 %v2083_v7, %v2048_v19 }
 0xa78   :  { %v2112_v55 = vadd.f32 %v2111_v29, %v2084_v15 }
 0xa7a   :  { %v2138_v23 = vadd.f32 %v2137_v59, %v2112_v55 }
 0xa7b   :  { %v2167_v60 = vpop.f32.mrf.mxu2 }
 0xa7c   :  { %v2168_v58 = vadd.f32 %v2167_v60, %v2138_v23 }
 0xa7e   :  { %v2192_v62 = vadd.f32 %v2191_v61, %v2168_v58 }
 0xa80   :  { %v2194_v16 = vsel %vm377_vm2, %v2192_v62, -inf }
 0xa81   :  { %2195 = vmax.xlane.f32.xlu2 %v2194_v16 }
 0xaf4   :  { %v2196_v21 = vpop.xlane.xlu2 %2195 }
 0xaf5   :  { %v2197_v63 = vsub.f32 %v2192_v62, %v2196_v21 }
 0xaf7   :  { %v2198_v0 = vmul.f32 1.442695, %v2197_v63 }
 0xaf9   :  { %2636 = vpow2.f32 %v2198_v0 }
 0xaff   :  { %v2637_v1 = vpop.eup %2636 }
 0xb00   :  { %v2200_v20 = vsel %vm377_vm2, %v2637_v1, 0.0 }
 0xb01   :  { %2201 = vadd.xlane.f32.xlu0 %v2200_v20 }
 0xb74   :  { %v2202_v49 = vpop.xlane.xlu0 %2201 }
 0xb75   :  { %2638 = vrcp.f32 %v2202_v49  ;;  %v2214_v4 = vand.u32 2147483648, %v2202_v49  ;;  %v2212_v6 = vand.u32 2147483647, %v2202_v49  ;;  %vm2208_vm8 = vweird.f32 %v2202_v49 }
 0xb77   :  { %v2215_v27 = vor.u32 1.1754944e-38, %v2214_v4  ;;  %vm2213_vm10 = vcmp.eq.f32.partialorder %v2212_v6, 8.507059e+37 }
 0xb7b   :  { %v2639_v24 = vpop.eup %2638 }
 0xb7c   :  { %v2204_v2 = vmul.f32 %v2639_v24, %v2202_v49  ;;  %vm2209_vm7 = vweird.f32 %v2639_v24 }
 0xb7d   :  { %vm2210_vm9 = vmor %vm2208_vm8, %vm2209_vm7 }
 0xb7e   :  { %v2205_v3 = vsub.f32 1.0, %v2204_v2 }
 0xb80   :  { %v2206_v5 = vmul.f32 %v2639_v24, %v2205_v3 }
 0xb82   :  { %v2207_v22 = vadd.f32 %v2639_v24, %v2206_v5 }
 0xb84   :  { %v2211_v8 = vsel %vm2210_vm9, %v2639_v24, %v2207_v22 }
 0xb85   :  { %v2216_v9 = vsel %vm2213_vm10, %v2215_v27, %v2211_v8 }
 0xb86   :  { %v2217_v10 = vmul.f32 %v2637_v1, %v2216_v9 }
 0xb88   :  { %2219 = vst.msk [vmem:[#allocation3 + $0x20] sm:$0xff] %vm377_vm2, %v2217_v10  ;;  %v2223_v25 = vsel %vm377_vm2, %v2217_v10, 0 }
 0xb89   :  { %v2243_v31 = vand.u32 4294901760, %v2223_v25 }
 0xb8b   :  { %2279 = vmatmul.f32.vlgmr.msra.gmra.mxu1 %v2243_v31  ;;  %v2244_v12 = vsub.f32 %v2223_v25, %v2243_v31 }
 0xb8c   :  { %2495 = vmatpush.msra.mxu1 %v2854_v36 }
 0xb8d   :  { %2305 = vmatmul.f32.vlgmr.msrb.gmra.mxu2 %v2244_v12  ;;  %v2245_v32 = vand.u32 4294901760, %v2244_v12 }
 0xb8e   :  { %2497 = vmatpush.msra.mxu1 %v2862_v40  ;;  %2523 = vmatpush.msrb.mxu2 %v2869_v43 }
 0xb8f   :  { %2330 = vmatmul.f32.vlgmr.msrb.gmra.mxu3 %v2245_v32  ;;  %v2246_v33 = vsub.f32 %v2244_v12, %v2245_v32 }
 0xb90   :  { %2499 = vmatpush.msra.mxu1 %v2874_v45  ;;  %2551 = vmatpush.msrb.mxu3 %v2854_v36 }
 0xb91   :  { %v2247_v35 = vand.u32 4294901760, %v2246_v33  ;;  %2527 = vmatpush.msrb.mxu2 %v2886_v50 }
 0xb92   :  { %2553 = vmatpush.msrb.mxu3 %v2862_v40 }
 0xb93   :  { %2248 = vmatmul.f32.vlgmr.msra.gmra.mxu0 %v2247_v35  ;;  %2380 = vmatmul.f32.vlgmr.msrb.gmra.mxu1 %v2243_v31 }
 0xb94   :  { %2468 = vmatpush.msra.mxu0 %v2860_v39  ;;  %2555 = vmatpush.msrb.mxu3 %v2874_v45 }
 0xb95   :  { %2531 = vmatpush.msrb.mxu2 %v2901_v57 }
 0xb96   :  { %2471 = vmatpush.msra.mxu0 %v2872_v44 }
 0xb98   :  { %2474 = vmatpush.msra.mxu0 %v2889_v51 }
 0xb9b   :  { %2357 = vmatmul.f32.vlgmr.msrb.gmra.mxu0 %v2243_v31 }
 0xc08   :  { %v2280_v43 = vpop.f32.mrf.mxu1 }
 0xc10   :  { %v2249_v36 = vpop.f32.mrf.mxu0  ;;  %v2306_v28 = vpop.f32.mrf.mxu2 }
 0xc11   :  { %v2281_v26 = vadd.f32 %v2280_v43, %v2249_v36  ;;  %v2381_v48 = vpop.f32.mrf.mxu1 }
 0xc12   :  { %v2331_v46 = vpop.f32.mrf.mxu3 }
 0xc13   :  { %v2307_v50 = vadd.f32 %v2306_v28, %v2281_v26 }
 0xc15   :  { %v2332_v40 = vadd.f32 %v2331_v46, %v2307_v50 }
 0xc18   :  { %v2358_v38 = vpop.f32.mrf.mxu0 }
 0xc19   :  { %v2359_v34 = vadd.f32 %v2358_v38, %v2332_v40 }
 0xc1b   :  { %v2382_v39 = vadd.f32 %v2381_v48, %v2359_v34 }
 0xc1d   :  { %v2384_v45 = vadd.f32 %v2382_v39, %v2221_v11 }
 0xc1f   :  { %2640 = vtanh.f32 %v2384_v45 }
 0xc25   :  { %v2641_v57 = vpop.eup %2640 }
 0xc26   :  { %v2387_v44 = vsel %vm362_vm4, %v2641_v57, 0 }
 0xc27   :  { %v2408_v30 = vand.u32 4294901760, %v2387_v44 }
 0xc29   :  { %2449 = vmatmul.f32.vlgmr.msra.gmra.mxu3 %v2408_v30  ;;  %v2409_v51 = vsub.f32 %v2387_v44, %v2408_v30 }
 0xc2b   :  { %2477 = vmatmul.f32.vlgmr.msra.gmra.mxu0 %v2409_v51  ;;  %v2410_v14 = vand.u32 4294901760, %v2409_v51 }
 0xc2d   :  { %2503 = vmatmul.f32.vlgmr.msra.gmra.mxu1 %v2410_v14  ;;  %v2411_v41 = vsub.f32 %v2409_v51, %v2410_v14 }
 0xc2f   :  { %v2412_v47 = vand.u32 4294901760, %v2411_v41 }
 0xc31   :  { %2413 = vmatmul.f32.vlgmr.msra.gmra.mxu2 %v2412_v47  ;;  %2557 = vmatmul.f32.vlgmr.msrb.gmra.mxu3 %v2408_v30 }
 0xc39   :  { %2533 = vmatmul.f32.vlgmr.msrb.gmra.mxu2 %v2408_v30 }
 0xca8   :  { %v2478_v52 = vpop.f32.mrf.mxu0 }
 0xcaa   :  { %v2504_v56 = vpop.f32.mrf.mxu1 }
 0xcac   :  { %v2450_v37 = vpop.f32.mrf.mxu3 }
 0xcb4   :  { %v2414_v53 = vpop.f32.mrf.mxu2  ;;  %v2558_v15 = vpop.f32.mrf.mxu3 }
 0xcb5   :  { %v2415_v13 = vadd.f32 %v2646_v42, %v2414_v53 }
 0xcb7   :  { %v2451_v17 = vadd.f32 %v2450_v37, %v2415_v13 }
 0xcb9   :  { %v2479_v54 = vadd.f32 %v2478_v52, %v2451_v17 }
 0xcbb   :  { %v2505_v7 = vadd.f32 %v2504_v56, %v2479_v54 }
 0xcbc   :  { %v2534_v18 = vpop.f32.mrf.mxu2 }
 0xcbd   :  { %v2535_v19 = vadd.f32 %v2534_v18, %v2505_v7 }
 0xcbf   :  { %v2559_v29 = vadd.f32 %v2558_v15, %v2535_v19 }
 0xcc1   :  { %v2561_v55 = vsel %vm377_vm2, %v2559_v29, -inf }
 0xcc2   :  { %2562 = vmax.xlane.f32.xlu1 %v2561_v55 }
 0xd35   :  { %v2563_v59 = vpop.xlane.xlu1 %2562 }
 0xd36   :  { %v2564_v23 = vsub.f32 %v2559_v29, %v2563_v59 }
 0xd38   :  { %v2565_v60 = vmul.f32 1.442695, %v2564_v23 }
 0xd3a   :  { %2642 = vpow2.f32 %v2565_v60 }
 0xd40   :  { %v2643_v58 = vpop.eup %2642 }
 0xd41   :  { %v2567_v61 = vsel %vm377_vm2, %v2643_v58, 0.0 }
 0xd42   :  { %2568 = vadd.xlane.f32.xlu2 %v2567_v61 }
 0xdb5   :  { %v2569_v62 = vpop.xlane.xlu2 %2568 }
 0xdb6   :  { %2644 = vrcp.f32 %v2569_v62  ;;  %v2581_v0 = vand.u32 2147483648, %v2569_v62  ;;  %v2579_v20 = vand.u32 2147483647, %v2569_v62  ;;  %vm2575_vm11 = vweird.f32 %v2569_v62 }
 0xdb8   :  { %v2582_v24 = vor.u32 1.1754944e-38, %v2581_v0  ;;  %vm2580_vm13 = vcmp.eq.f32.partialorder %v2579_v20, 8.507059e+37 }
 0xdbc   :  { %v2645_v16 = vpop.eup %2644 }
 0xdbd   :  { %v2571_v21 = vmul.f32 %v2645_v16, %v2569_v62  ;;  %vm2576_vm4 = vweird.f32 %v2645_v16 }
 0xdbe   :  { %vm2577_vm12 = vmor %vm2575_vm11, %vm2576_vm4 }
 0xdbf   :  { %v2572_v63 = vsub.f32 1.0, %v2571_v21 }
 0xdc1   :  { %v2573_v1 = vmul.f32 %v2645_v16, %v2572_v63 }
 0xdc3   :  { %v2574_v49 = vadd.f32 %v2645_v16, %v2573_v1 }
 0xdc5   :  { %v2578_v2 = vsel %vm2577_vm12, %v2645_v16, %v2574_v49 }
 0xdc6   :  { %v2583_v3 = vsel %vm2580_vm13, %v2582_v24, %v2578_v2 }
 0xdc7   :  { %v2584_v4 = vmul.f32 %v2643_v58, %v2583_v3 }
 0xdc9   :  { %2586 = vst.msk [vmem:[#allocation3 + $0x28] sm:$0xff] %vm377_vm2, %v2584_v4 }
 0xdca   :  { %2599 = dma.vmem_to_hbm [thread:$0]  %s2592_s27, 768, %s2594_s30, [#allocation4], %s2674_s8, %s2674_s8, %s2675_s2  }
 0xdcb   :  { %2671 = dma.done.wait [#allocation4], 768  }
 0xdcc   :  { %2672 = vsyncadd [#allocation4], 4294966528 }
 0xdcd   :  { %2604 = vsyncpa [#allocation4], 1 }

</bundles_post_ra>
